<compile_context>
chip_gen: v5e
topology: v5e:2x2
jax: 0.10.0
libtpu: 0.0.40
codegen_flags: <defaults>
</compile_context>

<pallas_src>
import jax
import jax.numpy as jnp
from jax import lax
from jax.experimental import pallas as pl
from jax.experimental.pallas import tpu as pltpu


def dip_c_kernel(gi_ref, w_hh_ref, b_hn_ref, att_w_ref, att_v_ref,
                 lin_w_ref, lin_b_ref, out_ref):
    _, T, B, H = gi_ref.shape
    Tm1 = T - 1

    # ---- loop-invariant weights: load once, keep resident in vregs ----------
    w_hh = w_hh_ref[...]            # (H, 3H), columns ordered [r | z | n]
    b_hn = b_hn_ref[...]            # (1, H)
    att_wt = att_w_ref[:H]          # (H, L)  multiplies repeated last_out
    att_wb = att_w_ref[H:]          # (H, L)  multiplies out[t]
    att_v = att_v_ref[...]          # (1, L)

    # ---- GRU recurrence (PyTorch gate order r, z, n), fully unrolled --------
    # T is small & static: a Python loop keeps h (and the attention-relevant
    # per-step values) in registers — no VMEM traffic on the serial chain.
    # TODO(synk): for large T switch to lax.fori_loop(..., unroll=k) + scratch.
    h = jnp.zeros((B, H), jnp.float32)
    hs = []      # (T-1) hidden states feeding attention/context
    projs = []   # (T-1) attention bottom-half projections
    for t in range(T):
        # One fused (B,H)@(H,3H) MXU transaction per step; the gate split is
        # static lane slicing (different VLIW slot than the MXU/VALU work).
        gh = jnp.dot(h, w_hh, preferred_element_type=jnp.float32)      # (B, 3H)
        r = jax.nn.sigmoid(gi_ref[0, t] + gh[:, :H])
        z = jax.nn.sigmoid(gi_ref[1, t] + gh[:, H:2 * H])
        n = jnp.tanh(gi_ref[2, t] + r * (gh[:, 2 * H:] + b_hn))
        h = (1.0 - z) * n + z * h
        if t < Tm1:
            hs.append(h)
            # Not on the serial h-dependency chain; overlaps with next step.
            projs.append(jnp.dot(h, att_wb, preferred_element_type=jnp.float32))
    last_out = h                                                        # (B, H)

    # ---- attention scores: s_t = <tanh(out_t@Wb + last_out@Wt), v> ----------
    last_proj = jnp.dot(last_out, att_wt, preferred_element_type=jnp.float32)  # (B, L)
    ss = [jnp.sum(jnp.tanh(p + last_proj) * att_v, axis=-1, keepdims=True)
          for p in projs]                                               # each (B, 1)

    # ---- stabilized softmax over time + context, register-resident ----------
    m = ss[0]
    for s in ss[1:]:
        m = jnp.maximum(m, s)
    ps = [jnp.exp(s - m) for s in ss]
    denom = ps[0]
    for p in ps[1:]:
        denom = denom + p
    inv = pl.reciprocal(denom, approx=True)        # EUP slot is idle here
    ctx = ps[0] * hs[0]
    for p, hv in zip(ps[1:], hs[1:]):
        ctx = ctx + p * hv
    sum_context = ctx * inv                        # (B, H)

    # ---- final linear: [last_out, sum_context] @ W^T + b ---------------------
    out_ref[...] = (
        jnp.dot(last_out, lin_w_ref[:H], preferred_element_type=jnp.float32)
        + jnp.dot(sum_context, lin_w_ref[H:], preferred_element_type=jnp.float32)
        + lin_b_ref[...]
    )


def _dip_c_forward(x, params):
    """x: (B, T, D) float32. Returns (B, output_dim) float32."""
    B, T, D = x.shape
    H = params["w_hh"].shape[1]
    L = params["att_t"].shape[0]
    O = params["lin_w"].shape[0]
    f32 = jnp.float32
    x = x.astype(f32)

    # Input projection hoisted out of the recurrence: one (B*T, D) x (D, 3H)
    # matmul done by XLA (the time-major permute fuses into it), packed as a
    # single (3, T, B, H) slab (one DMA) indexed gi_ref[g, t] in the kernel.
    w_ih_g = params["w_ih"].reshape(3, H, D).astype(f32)          # gate order r, z, n
    b_ih_g = params["b_ih"].reshape(3, H).astype(f32)
    b_hh_g = params["b_hh"].reshape(3, H).astype(f32)
    # Fold b_hr and b_hz into gi (they add linearly); b_hn must stay in the
    # kernel because it sits inside r * (h @ w_hn + b_hn).
    b_fold = b_ih_g.at[:2].add(b_hh_g[:2])
    gi = jnp.einsum("btd,ghd->gtbh", x, w_ih_g) + b_fold[:, None, None, :]  # (3,T,B,H)
    b_hn = b_hh_g[2].reshape(1, H)

    # hh weights as one (H, 3H) slab already transposed for h @ W.
    w_hh_cat = params["w_hh"].T.astype(f32)                       # (H, 3H)

    att_w = params["att_t"].T.astype(f32)                         # (2H, L): [:H]->last_out, [H:]->out[t]
    att_v = params["att_v"].astype(f32)                           # (1, L)
    lin_w = params["lin_w"].T.astype(f32)                         # (2H, O)
    lin_b = params["lin_b"].reshape(1, O).astype(f32)

    vmem = pl.BlockSpec(memory_space=pltpu.MemorySpace.VMEM)
    # TODO(synk): for production-sized B on v7x, add a batch-parallel grid
    # (BlockSpecs tiling B, dimension_semantics=("parallel",)) to use both TCs.
    return pl.pallas_call(
        dip_c_kernel,
        out_shape=jax.ShapeDtypeStruct((B, O), f32),
        in_specs=[vmem] * 7,
        out_specs=vmem,
    )(gi, w_hh_cat, b_hn, att_w, att_v, lin_w, lin_b)


dip_c_forward = jax.jit(_dip_c_forward)


def dip_c_reference(x, p):
    """Pure-JAX reference mirroring the PyTorch forward exactly."""
    B, T, D = x.shape
    H = p["w_hh"].shape[1]

    def step(h, x_t):
        gi = x_t @ p["w_ih"].T + p["b_ih"]
        gh = h @ p["w_hh"].T + p["b_hh"]
        r = jax.nn.sigmoid(gi[:, :H] + gh[:, :H])
        z = jax.nn.sigmoid(gi[:, H:2 * H] + gh[:, H:2 * H])
        n = jnp.tanh(gi[:, 2 * H:] + r * gh[:, 2 * H:])
        h_new = (1.0 - z) * n + z * h
        return h_new, h_new

    h0 = jnp.zeros((B, H), jnp.float32)
    _, hs = lax.scan(step, h0, jnp.transpose(x, (1, 0, 2)))   # (T, B, H)
    rnn_out = jnp.transpose(hs, (1, 0, 2))                    # (B, T, H)
    out = rnn_out[:, :-1, :]
    last_out = rnn_out[:, -1, :]
    re_ht = jnp.repeat(last_out[:, None, :], T - 1, axis=1)
    concat = jnp.concatenate([re_ht, out], axis=2)
    e = jnp.tanh(concat @ p["att_t"].T)
    s = e @ p["att_v"].T
    a = jax.nn.softmax(s, axis=1)
    sum_ctx = jnp.sum(a * out, axis=1)
    cc = jnp.concatenate([last_out, sum_ctx], axis=1)
    return cc @ p["lin_w"].T + p["lin_b"]


def init_params(key, input_dim, hidden_dim, output_dim, latent=16):
    ks = jax.random.split(key, 8)
    s = 0.1
    H, D, O, L = hidden_dim, input_dim, output_dim, latent
    return {
        "w_ih": jax.random.uniform(ks[0], (3 * H, D), jnp.float32, -s, s),
        "w_hh": jax.random.uniform(ks[1], (3 * H, H), jnp.float32, -s, s),
        "b_ih": jax.random.uniform(ks[2], (3 * H,), jnp.float32, -s, s),
        "b_hh": jax.random.uniform(ks[3], (3 * H,), jnp.float32, -s, s),
        "att_t": jax.random.uniform(ks[4], (L, 2 * H), jnp.float32, -s, s),
        "att_v": jax.random.uniform(ks[5], (1, L), jnp.float32, -s, s),
        "lin_w": jax.random.uniform(ks[6], (O, 2 * H), jnp.float32, -s, s),
        "lin_b": jax.random.uniform(ks[7], (O,), jnp.float32, -s, s),
    }


if __name__ == "__main__":
    # Small shapes consistent with the module:
    # batch=2, max_timesteps=8, input_dim=4, hidden_dim=32, output_dim=5, latent=16
    B, T, D, H, O = 2, 8, 4, 32, 5
    key = jax.random.PRNGKey(0)
    k_x, k_p = jax.random.split(key)
    x = jax.random.normal(k_x, (B, T, D), jnp.float32)
    params = init_params(k_p, D, H, O)

    out = jax.block_until_ready(dip_c_forward(x, params))
    ref = jax.block_until_ready(dip_c_reference(x, params))

    assert out.shape == (B, O)
    # Tolerance slightly relaxed vs 1e-4 only because of the approximate EUP
    # reciprocal in the softmax normalization; all matmuls/elementwise are f32.
    assert jnp.allclose(out, ref, atol=1e-3, rtol=1e-3), (out, ref)
    print("KERNEL_OK")
</pallas_src>

<mosaic_0001>
module attributes {stable_mosaic.version = 11 : i64} {
  func.func @dip_c_kernel(%arg0: memref<3x8x2x32xf32, #tpu.memory_space<vmem>>, %arg1: memref<32x96xf32, #tpu.memory_space<vmem>>, %arg2: memref<1x32xf32, #tpu.memory_space<vmem>>, %arg3: memref<64x16xf32, #tpu.memory_space<vmem>>, %arg4: memref<1x16xf32, #tpu.memory_space<vmem>>, %arg5: memref<64x5xf32, #tpu.memory_space<vmem>>, %arg6: memref<1x5xf32, #tpu.memory_space<vmem>>, %arg7: memref<2x5xf32, #tpu.memory_space<vmem>>) attributes {dimension_semantics = [], scalar_prefetch = 0 : i64, scratch_operands = 0 : i64, tpu.core_type = #tpu.core_type<tc>} {
    %c0 = arith.constant 0 : index
    %c0_0 = arith.constant 0 : index
    %0 = vector.load %arg1[%c0, %c0_0] : memref<32x96xf32, #tpu.memory_space<vmem>>, vector<32x96xf32>
    %c0_1 = arith.constant 0 : index
    %c0_2 = arith.constant 0 : index
    %1 = vector.load %arg2[%c0_1, %c0_2] : memref<1x32xf32, #tpu.memory_space<vmem>>, vector<1x32xf32>
    %c0_3 = arith.constant 0 : index
    %c0_4 = arith.constant 0 : index
    %2 = vector.load %arg3[%c0_3, %c0_4] : memref<64x16xf32, #tpu.memory_space<vmem>>, vector<32x16xf32>
    %c32 = arith.constant 32 : index
    %c0_5 = arith.constant 0 : index
    %3 = vector.load %arg3[%c32, %c0_5] : memref<64x16xf32, #tpu.memory_space<vmem>>, vector<32x16xf32>
    %c0_6 = arith.constant 0 : index
    %c0_7 = arith.constant 0 : index
    %4 = vector.load %arg4[%c0_6, %c0_7] : memref<1x16xf32, #tpu.memory_space<vmem>>, vector<1x16xf32>
    %cst = arith.constant 0.000000e+00 : f32
    %5 = vector.broadcast %cst : f32 to vector<2x32xf32>
    %cst_8 = arith.constant dense<0.000000e+00> : vector<2x96xf32>
    %6 = tpu.matmul %5, %0, %cst_8 {dimension_numbers = #tpu.dot_dimension_numbers<[1], [0], [0], [1], [0, 0, 1, 1], [], []>} : vector<2x32xf32>, vector<32x96xf32>, vector<2x96xf32> -> vector<2x96xf32>
    %c0_9 = arith.constant 0 : index
    %c0_10 = arith.constant 0 : index
    %c0_11 = arith.constant 0 : index
    %c0_12 = arith.constant 0 : index
    %7 = vector.load %arg0[%c0_9, %c0_10, %c0_11, %c0_12] : memref<3x8x2x32xf32, #tpu.memory_space<vmem>>, vector<1x1x2x32xf32>
    %8 = vector.shape_cast %7 : vector<1x1x2x32xf32> to vector<2x32xf32>
    %9 = vector.extract_strided_slice %6 {offsets = [0, 0], sizes = [2, 32], strides = [1, 1]} : vector<2x96xf32> to vector<2x32xf32>
    %10 = arith.addf %8, %9 : vector<2x32xf32>
    %11 = arith.negf %10 : vector<2x32xf32>
    %12 = math.exp %11 : vector<2x32xf32>
    %cst_13 = arith.constant 1.000000e+00 : f32
    %13 = vector.broadcast %cst_13 : f32 to vector<2x32xf32>
    %14 = arith.addf %13, %12 : vector<2x32xf32>
    %15 = arith.divf %13, %14 : vector<2x32xf32>
    %c1 = arith.constant 1 : index
    %c0_14 = arith.constant 0 : index
    %c0_15 = arith.constant 0 : index
    %c0_16 = arith.constant 0 : index
    %16 = vector.load %arg0[%c1, %c0_14, %c0_15, %c0_16] : memref<3x8x2x32xf32, #tpu.memory_space<vmem>>, vector<1x1x2x32xf32>
    %17 = vector.shape_cast %16 : vector<1x1x2x32xf32> to vector<2x32xf32>
    %18 = vector.extract_strided_slice %6 {offsets = [0, 32], sizes = [2, 32], strides = [1, 1]} : vector<2x96xf32> to vector<2x32xf32>
    %19 = arith.addf %17, %18 : vector<2x32xf32>
    %20 = arith.negf %19 : vector<2x32xf32>
    %21 = math.exp %20 : vector<2x32xf32>
    %cst_17 = arith.constant 1.000000e+00 : f32
    %22 = vector.broadcast %cst_17 : f32 to vector<2x32xf32>
    %23 = arith.addf %22, %21 : vector<2x32xf32>
    %24 = arith.divf %22, %23 : vector<2x32xf32>
    %c2 = arith.constant 2 : index
    %c0_18 = arith.constant 0 : index
    %c0_19 = arith.constant 0 : index
    %c0_20 = arith.constant 0 : index
    %25 = vector.load %arg0[%c2, %c0_18, %c0_19, %c0_20] : memref<3x8x2x32xf32, #tpu.memory_space<vmem>>, vector<1x1x2x32xf32>
    %26 = vector.shape_cast %25 : vector<1x1x2x32xf32> to vector<2x32xf32>
    %27 = vector.extract_strided_slice %6 {offsets = [0, 64], sizes = [2, 32], strides = [1, 1]} : vector<2x96xf32> to vector<2x32xf32>
    %28 = vector.broadcast %1 : vector<1x32xf32> to vector<2x32xf32>
    %29 = arith.addf %27, %28 : vector<2x32xf32>
    %30 = arith.mulf %15, %29 : vector<2x32xf32>
    %31 = arith.addf %26, %30 : vector<2x32xf32>
    %32 = math.tanh %31 : vector<2x32xf32>
    %cst_21 = arith.constant 1.000000e+00 : f32
    %33 = vector.broadcast %cst_21 : f32 to vector<2x32xf32>
    %34 = arith.subf %33, %24 : vector<2x32xf32>
    %35 = arith.mulf %34, %32 : vector<2x32xf32>
    %36 = arith.mulf %24, %5 : vector<2x32xf32>
    %37 = arith.addf %35, %36 : vector<2x32xf32>
    %cst_22 = arith.constant dense<0.000000e+00> : vector<2x16xf32>
    %38 = tpu.matmul %37, %3, %cst_22 {dimension_numbers = #tpu.dot_dimension_numbers<[1], [0], [0], [1], [0, 0, 1, 1], [], []>} : vector<2x32xf32>, vector<32x16xf32>, vector<2x16xf32> -> vector<2x16xf32>
    %cst_23 = arith.constant dense<0.000000e+00> : vector<2x96xf32>
    %39 = tpu.matmul %37, %0, %cst_23 {dimension_numbers = #tpu.dot_dimension_numbers<[1], [0], [0], [1], [0, 0, 1, 1], [], []>} : vector<2x32xf32>, vector<32x96xf32>, vector<2x96xf32> -> vector<2x96xf32>
    %c0_24 = arith.constant 0 : index
    %c1_25 = arith.constant 1 : index
    %c0_26 = arith.constant 0 : index
    %c0_27 = arith.constant 0 : index
    %40 = vector.load %arg0[%c0_24, %c1_25, %c0_26, %c0_27] : memref<3x8x2x32xf32, #tpu.memory_space<vmem>>, vector<1x1x2x32xf32>
    %41 = vector.shape_cast %40 : vector<1x1x2x32xf32> to vector<2x32xf32>
    %42 = vector.extract_strided_slice %39 {offsets = [0, 0], sizes = [2, 32], strides = [1, 1]} : vector<2x96xf32> to vector<2x32xf32>
    %43 = arith.addf %41, %42 : vector<2x32xf32>
    %44 = arith.negf %43 : vector<2x32xf32>
    %45 = math.exp %44 : vector<2x32xf32>
    %cst_28 = arith.constant 1.000000e+00 : f32
    %46 = vector.broadcast %cst_28 : f32 to vector<2x32xf32>
    %47 = arith.addf %46, %45 : vector<2x32xf32>
    %48 = arith.divf %46, %47 : vector<2x32xf32>
    %c1_29 = arith.constant 1 : index
    %c1_30 = arith.constant 1 : index
    %c0_31 = arith.constant 0 : index
    %c0_32 = arith.constant 0 : index
    %49 = vector.load %arg0[%c1_29, %c1_30, %c0_31, %c0_32] : memref<3x8x2x32xf32, #tpu.memory_space<vmem>>, vector<1x1x2x32xf32>
    %50 = vector.shape_cast %49 : vector<1x1x2x32xf32> to vector<2x32xf32>
    %51 = vector.extract_strided_slice %39 {offsets = [0, 32], sizes = [2, 32], strides = [1, 1]} : vector<2x96xf32> to vector<2x32xf32>
    %52 = arith.addf %50, %51 : vector<2x32xf32>
    %53 = arith.negf %52 : vector<2x32xf32>
    %54 = math.exp %53 : vector<2x32xf32>
    %cst_33 = arith.constant 1.000000e+00 : f32
    %55 = vector.broadcast %cst_33 : f32 to vector<2x32xf32>
    %56 = arith.addf %55, %54 : vector<2x32xf32>
    %57 = arith.divf %55, %56 : vector<2x32xf32>
    %c2_34 = arith.constant 2 : index
    %c1_35 = arith.constant 1 : index
    %c0_36 = arith.constant 0 : index
    %c0_37 = arith.constant 0 : index
    %58 = vector.load %arg0[%c2_34, %c1_35, %c0_36, %c0_37] : memref<3x8x2x32xf32, #tpu.memory_space<vmem>>, vector<1x1x2x32xf32>
    %59 = vector.shape_cast %58 : vector<1x1x2x32xf32> to vector<2x32xf32>
    %60 = vector.extract_strided_slice %39 {offsets = [0, 64], sizes = [2, 32], strides = [1, 1]} : vector<2x96xf32> to vector<2x32xf32>
    %61 = vector.broadcast %1 : vector<1x32xf32> to vector<2x32xf32>
    %62 = arith.addf %60, %61 : vector<2x32xf32>
    %63 = arith.mulf %48, %62 : vector<2x32xf32>
    %64 = arith.addf %59, %63 : vector<2x32xf32>
    %65 = math.tanh %64 : vector<2x32xf32>
    %cst_38 = arith.constant 1.000000e+00 : f32
    %66 = vector.broadcast %cst_38 : f32 to vector<2x32xf32>
    %67 = arith.subf %66, %57 : vector<2x32xf32>
    %68 = arith.mulf %67, %65 : vector<2x32xf32>
    %69 = arith.mulf %57, %37 : vector<2x32xf32>
    %70 = arith.addf %68, %69 : vector<2x32xf32>
    %cst_39 = arith.constant dense<0.000000e+00> : vector<2x16xf32>
    %71 = tpu.matmul %70, %3, %cst_39 {dimension_numbers = #tpu.dot_dimension_numbers<[1], [0], [0], [1], [0, 0, 1, 1], [], []>} : vector<2x32xf32>, vector<32x16xf32>, vector<2x16xf32> -> vector<2x16xf32>
    %cst_40 = arith.constant dense<0.000000e+00> : vector<2x96xf32>
    %72 = tpu.matmul %70, %0, %cst_40 {dimension_numbers = #tpu.dot_dimension_numbers<[1], [0], [0], [1], [0, 0, 1, 1], [], []>} : vector<2x32xf32>, vector<32x96xf32>, vector<2x96xf32> -> vector<2x96xf32>
    %c0_41 = arith.constant 0 : index
    %c2_42 = arith.constant 2 : index
    %c0_43 = arith.constant 0 : index
    %c0_44 = arith.constant 0 : index
    %73 = vector.load %arg0[%c0_41, %c2_42, %c0_43, %c0_44] : memref<3x8x2x32xf32, #tpu.memory_space<vmem>>, vector<1x1x2x32xf32>
    %74 = vector.shape_cast %73 : vector<1x1x2x32xf32> to vector<2x32xf32>
    %75 = vector.extract_strided_slice %72 {offsets = [0, 0], sizes = [2, 32], strides = [1, 1]} : vector<2x96xf32> to vector<2x32xf32>
    %76 = arith.addf %74, %75 : vector<2x32xf32>
    %77 = arith.negf %76 : vector<2x32xf32>
    %78 = math.exp %77 : vector<2x32xf32>
    %cst_45 = arith.constant 1.000000e+00 : f32
    %79 = vector.broadcast %cst_45 : f32 to vector<2x32xf32>
    %80 = arith.addf %79, %78 : vector<2x32xf32>
    %81 = arith.divf %79, %80 : vector<2x32xf32>
    %c1_46 = arith.constant 1 : index
    %c2_47 = arith.constant 2 : index
    %c0_48 = arith.constant 0 : index
    %c0_49 = arith.constant 0 : index
    %82 = vector.load %arg0[%c1_46, %c2_47, %c0_48, %c0_49] : memref<3x8x2x32xf32, #tpu.memory_space<vmem>>, vector<1x1x2x32xf32>
    %83 = vector.shape_cast %82 : vector<1x1x2x32xf32> to vector<2x32xf32>
    %84 = vector.extract_strided_slice %72 {offsets = [0, 32], sizes = [2, 32], strides = [1, 1]} : vector<2x96xf32> to vector<2x32xf32>
    %85 = arith.addf %83, %84 : vector<2x32xf32>
    %86 = arith.negf %85 : vector<2x32xf32>
    %87 = math.exp %86 : vector<2x32xf32>
    %cst_50 = arith.constant 1.000000e+00 : f32
    %88 = vector.broadcast %cst_50 : f32 to vector<2x32xf32>
    %89 = arith.addf %88, %87 : vector<2x32xf32>
    %90 = arith.divf %88, %89 : vector<2x32xf32>
    %c2_51 = arith.constant 2 : index
    %c2_52 = arith.constant 2 : index
    %c0_53 = arith.constant 0 : index
    %c0_54 = arith.constant 0 : index
    %91 = vector.load %arg0[%c2_51, %c2_52, %c0_53, %c0_54] : memref<3x8x2x32xf32, #tpu.memory_space<vmem>>, vector<1x1x2x32xf32>
    %92 = vector.shape_cast %91 : vector<1x1x2x32xf32> to vector<2x32xf32>
    %93 = vector.extract_strided_slice %72 {offsets = [0, 64], sizes = [2, 32], strides = [1, 1]} : vector<2x96xf32> to vector<2x32xf32>
    %94 = vector.broadcast %1 : vector<1x32xf32> to vector<2x32xf32>
    %95 = arith.addf %93, %94 : vector<2x32xf32>
    %96 = arith.mulf %81, %95 : vector<2x32xf32>
    %97 = arith.addf %92, %96 : vector<2x32xf32>
    %98 = math.tanh %97 : vector<2x32xf32>
    %cst_55 = arith.constant 1.000000e+00 : f32
    %99 = vector.broadcast %cst_55 : f32 to vector<2x32xf32>
    %100 = arith.subf %99, %90 : vector<2x32xf32>
    %101 = arith.mulf %100, %98 : vector<2x32xf32>
    %102 = arith.mulf %90, %70 : vector<2x32xf32>
    %103 = arith.addf %101, %102 : vector<2x32xf32>
    %cst_56 = arith.constant dense<0.000000e+00> : vector<2x16xf32>
    %104 = tpu.matmul %103, %3, %cst_56 {dimension_numbers = #tpu.dot_dimension_numbers<[1], [0], [0], [1], [0, 0, 1, 1], [], []>} : vector<2x32xf32>, vector<32x16xf32>, vector<2x16xf32> -> vector<2x16xf32>
    %cst_57 = arith.constant dense<0.000000e+00> : vector<2x96xf32>
    %105 = tpu.matmul %103, %0, %cst_57 {dimension_numbers = #tpu.dot_dimension_numbers<[1], [0], [0], [1], [0, 0, 1, 1], [], []>} : vector<2x32xf32>, vector<32x96xf32>, vector<2x96xf32> -> vector<2x96xf32>
    %c0_58 = arith.constant 0 : index
    %c3 = arith.constant 3 : index
    %c0_59 = arith.constant 0 : index
    %c0_60 = arith.constant 0 : index
    %106 = vector.load %arg0[%c0_58, %c3, %c0_59, %c0_60] : memref<3x8x2x32xf32, #tpu.memory_space<vmem>>, vector<1x1x2x32xf32>
    %107 = vector.shape_cast %106 : vector<1x1x2x32xf32> to vector<2x32xf32>
    %108 = vector.extract_strided_slice %105 {offsets = [0, 0], sizes = [2, 32], strides = [1, 1]} : vector<2x96xf32> to vector<2x32xf32>
    %109 = arith.addf %107, %108 : vector<2x32xf32>
    %110 = arith.negf %109 : vector<2x32xf32>
    %111 = math.exp %110 : vector<2x32xf32>
    %cst_61 = arith.constant 1.000000e+00 : f32
    %112 = vector.broadcast %cst_61 : f32 to vector<2x32xf32>
    %113 = arith.addf %112, %111 : vector<2x32xf32>
    %114 = arith.divf %112, %113 : vector<2x32xf32>
    %c1_62 = arith.constant 1 : index
    %c3_63 = arith.constant 3 : index
    %c0_64 = arith.constant 0 : index
    %c0_65 = arith.constant 0 : index
    %115 = vector.load %arg0[%c1_62, %c3_63, %c0_64, %c0_65] : memref<3x8x2x32xf32, #tpu.memory_space<vmem>>, vector<1x1x2x32xf32>
    %116 = vector.shape_cast %115 : vector<1x1x2x32xf32> to vector<2x32xf32>
    %117 = vector.extract_strided_slice %105 {offsets = [0, 32], sizes = [2, 32], strides = [1, 1]} : vector<2x96xf32> to vector<2x32xf32>
    %118 = arith.addf %116, %117 : vector<2x32xf32>
    %119 = arith.negf %118 : vector<2x32xf32>
    %120 = math.exp %119 : vector<2x32xf32>
    %cst_66 = arith.constant 1.000000e+00 : f32
    %121 = vector.broadcast %cst_66 : f32 to vector<2x32xf32>
    %122 = arith.addf %121, %120 : vector<2x32xf32>
    %123 = arith.divf %121, %122 : vector<2x32xf32>
    %c2_67 = arith.constant 2 : index
    %c3_68 = arith.constant 3 : index
    %c0_69 = arith.constant 0 : index
    %c0_70 = arith.constant 0 : index
    %124 = vector.load %arg0[%c2_67, %c3_68, %c0_69, %c0_70] : memref<3x8x2x32xf32, #tpu.memory_space<vmem>>, vector<1x1x2x32xf32>
    %125 = vector.shape_cast %124 : vector<1x1x2x32xf32> to vector<2x32xf32>
    %126 = vector.extract_strided_slice %105 {offsets = [0, 64], sizes = [2, 32], strides = [1, 1]} : vector<2x96xf32> to vector<2x32xf32>
    %127 = vector.broadcast %1 : vector<1x32xf32> to vector<2x32xf32>
    %128 = arith.addf %126, %127 : vector<2x32xf32>
    %129 = arith.mulf %114, %128 : vector<2x32xf32>
    %130 = arith.addf %125, %129 : vector<2x32xf32>
    %131 = math.tanh %130 : vector<2x32xf32>
    %cst_71 = arith.constant 1.000000e+00 : f32
    %132 = vector.broadcast %cst_71 : f32 to vector<2x32xf32>
    %133 = arith.subf %132, %123 : vector<2x32xf32>
    %134 = arith.mulf %133, %131 : vector<2x32xf32>
    %135 = arith.mulf %123, %103 : vector<2x32xf32>
    %136 = arith.addf %134, %135 : vector<2x32xf32>
    %cst_72 = arith.constant dense<0.000000e+00> : vector<2x16xf32>
    %137 = tpu.matmul %136, %3, %cst_72 {dimension_numbers = #tpu.dot_dimension_numbers<[1], [0], [0], [1], [0, 0, 1, 1], [], []>} : vector<2x32xf32>, vector<32x16xf32>, vector<2x16xf32> -> vector<2x16xf32>
    %cst_73 = arith.constant dense<0.000000e+00> : vector<2x96xf32>
    %138 = tpu.matmul %136, %0, %cst_73 {dimension_numbers = #tpu.dot_dimension_numbers<[1], [0], [0], [1], [0, 0, 1, 1], [], []>} : vector<2x32xf32>, vector<32x96xf32>, vector<2x96xf32> -> vector<2x96xf32>
    %c0_74 = arith.constant 0 : index
    %c4 = arith.constant 4 : index
    %c0_75 = arith.constant 0 : index
    %c0_76 = arith.constant 0 : index
    %139 = vector.load %arg0[%c0_74, %c4, %c0_75, %c0_76] : memref<3x8x2x32xf32, #tpu.memory_space<vmem>>, vector<1x1x2x32xf32>
    %140 = vector.shape_cast %139 : vector<1x1x2x32xf32> to vector<2x32xf32>
    %141 = vector.extract_strided_slice %138 {offsets = [0, 0], sizes = [2, 32], strides = [1, 1]} : vector<2x96xf32> to vector<2x32xf32>
    %142 = arith.addf %140, %141 : vector<2x32xf32>
    %143 = arith.negf %142 : vector<2x32xf32>
    %144 = math.exp %143 : vector<2x32xf32>
    %cst_77 = arith.constant 1.000000e+00 : f32
    %145 = vector.broadcast %cst_77 : f32 to vector<2x32xf32>
    %146 = arith.addf %145, %144 : vector<2x32xf32>
    %147 = arith.divf %145, %146 : vector<2x32xf32>
    %c1_78 = arith.constant 1 : index
    %c4_79 = arith.constant 4 : index
    %c0_80 = arith.constant 0 : index
    %c0_81 = arith.constant 0 : index
    %148 = vector.load %arg0[%c1_78, %c4_79, %c0_80, %c0_81] : memref<3x8x2x32xf32, #tpu.memory_space<vmem>>, vector<1x1x2x32xf32>
    %149 = vector.shape_cast %148 : vector<1x1x2x32xf32> to vector<2x32xf32>
    %150 = vector.extract_strided_slice %138 {offsets = [0, 32], sizes = [2, 32], strides = [1, 1]} : vector<2x96xf32> to vector<2x32xf32>
    %151 = arith.addf %149, %150 : vector<2x32xf32>
    %152 = arith.negf %151 : vector<2x32xf32>
    %153 = math.exp %152 : vector<2x32xf32>
    %cst_82 = arith.constant 1.000000e+00 : f32
    %154 = vector.broadcast %cst_82 : f32 to vector<2x32xf32>
    %155 = arith.addf %154, %153 : vector<2x32xf32>
    %156 = arith.divf %154, %155 : vector<2x32xf32>
    %c2_83 = arith.constant 2 : index
    %c4_84 = arith.constant 4 : index
    %c0_85 = arith.constant 0 : index
    %c0_86 = arith.constant 0 : index
    %157 = vector.load %arg0[%c2_83, %c4_84, %c0_85, %c0_86] : memref<3x8x2x32xf32, #tpu.memory_space<vmem>>, vector<1x1x2x32xf32>
    %158 = vector.shape_cast %157 : vector<1x1x2x32xf32> to vector<2x32xf32>
    %159 = vector.extract_strided_slice %138 {offsets = [0, 64], sizes = [2, 32], strides = [1, 1]} : vector<2x96xf32> to vector<2x32xf32>
    %160 = vector.broadcast %1 : vector<1x32xf32> to vector<2x32xf32>
    %161 = arith.addf %159, %160 : vector<2x32xf32>
    %162 = arith.mulf %147, %161 : vector<2x32xf32>
    %163 = arith.addf %158, %162 : vector<2x32xf32>
    %164 = math.tanh %163 : vector<2x32xf32>
    %cst_87 = arith.constant 1.000000e+00 : f32
    %165 = vector.broadcast %cst_87 : f32 to vector<2x32xf32>
    %166 = arith.subf %165, %156 : vector<2x32xf32>
    %167 = arith.mulf %166, %164 : vector<2x32xf32>
    %168 = arith.mulf %156, %136 : vector<2x32xf32>
    %169 = arith.addf %167, %168 : vector<2x32xf32>
    %cst_88 = arith.constant dense<0.000000e+00> : vector<2x16xf32>
    %170 = tpu.matmul %169, %3, %cst_88 {dimension_numbers = #tpu.dot_dimension_numbers<[1], [0], [0], [1], [0, 0, 1, 1], [], []>} : vector<2x32xf32>, vector<32x16xf32>, vector<2x16xf32> -> vector<2x16xf32>
    %cst_89 = arith.constant dense<0.000000e+00> : vector<2x96xf32>
    %171 = tpu.matmul %169, %0, %cst_89 {dimension_numbers = #tpu.dot_dimension_numbers<[1], [0], [0], [1], [0, 0, 1, 1], [], []>} : vector<2x32xf32>, vector<32x96xf32>, vector<2x96xf32> -> vector<2x96xf32>
    %c0_90 = arith.constant 0 : index
    %c5 = arith.constant 5 : index
    %c0_91 = arith.constant 0 : index
    %c0_92 = arith.constant 0 : index
    %172 = vector.load %arg0[%c0_90, %c5, %c0_91, %c0_92] : memref<3x8x2x32xf32, #tpu.memory_space<vmem>>, vector<1x1x2x32xf32>
    %173 = vector.shape_cast %172 : vector<1x1x2x32xf32> to vector<2x32xf32>
    %174 = vector.extract_strided_slice %171 {offsets = [0, 0], sizes = [2, 32], strides = [1, 1]} : vector<2x96xf32> to vector<2x32xf32>
    %175 = arith.addf %173, %174 : vector<2x32xf32>
    %176 = arith.negf %175 : vector<2x32xf32>
    %177 = math.exp %176 : vector<2x32xf32>
    %cst_93 = arith.constant 1.000000e+00 : f32
    %178 = vector.broadcast %cst_93 : f32 to vector<2x32xf32>
    %179 = arith.addf %178, %177 : vector<2x32xf32>
    %180 = arith.divf %178, %179 : vector<2x32xf32>
    %c1_94 = arith.constant 1 : index
    %c5_95 = arith.constant 5 : index
    %c0_96 = arith.constant 0 : index
    %c0_97 = arith.constant 0 : index
    %181 = vector.load %arg0[%c1_94, %c5_95, %c0_96, %c0_97] : memref<3x8x2x32xf32, #tpu.memory_space<vmem>>, vector<1x1x2x32xf32>
    %182 = vector.shape_cast %181 : vector<1x1x2x32xf32> to vector<2x32xf32>
    %183 = vector.extract_strided_slice %171 {offsets = [0, 32], sizes = [2, 32], strides = [1, 1]} : vector<2x96xf32> to vector<2x32xf32>
    %184 = arith.addf %182, %183 : vector<2x32xf32>
    %185 = arith.negf %184 : vector<2x32xf32>
    %186 = math.exp %185 : vector<2x32xf32>
    %cst_98 = arith.constant 1.000000e+00 : f32
    %187 = vector.broadcast %cst_98 : f32 to vector<2x32xf32>
    %188 = arith.addf %187, %186 : vector<2x32xf32>
    %189 = arith.divf %187, %188 : vector<2x32xf32>
    %c2_99 = arith.constant 2 : index
    %c5_100 = arith.constant 5 : index
    %c0_101 = arith.constant 0 : index
    %c0_102 = arith.constant 0 : index
    %190 = vector.load %arg0[%c2_99, %c5_100, %c0_101, %c0_102] : memref<3x8x2x32xf32, #tpu.memory_space<vmem>>, vector<1x1x2x32xf32>
    %191 = vector.shape_cast %190 : vector<1x1x2x32xf32> to vector<2x32xf32>
    %192 = vector.extract_strided_slice %171 {offsets = [0, 64], sizes = [2, 32], strides = [1, 1]} : vector<2x96xf32> to vector<2x32xf32>
    %193 = vector.broadcast %1 : vector<1x32xf32> to vector<2x32xf32>
    %194 = arith.addf %192, %193 : vector<2x32xf32>
    %195 = arith.mulf %180, %194 : vector<2x32xf32>
    %196 = arith.addf %191, %195 : vector<2x32xf32>
    %197 = math.tanh %196 : vector<2x32xf32>
    %cst_103 = arith.constant 1.000000e+00 : f32
    %198 = vector.broadcast %cst_103 : f32 to vector<2x32xf32>
    %199 = arith.subf %198, %189 : vector<2x32xf32>
    %200 = arith.mulf %199, %197 : vector<2x32xf32>
    %201 = arith.mulf %189, %169 : vector<2x32xf32>
    %202 = arith.addf %200, %201 : vector<2x32xf32>
    %cst_104 = arith.constant dense<0.000000e+00> : vector<2x16xf32>
    %203 = tpu.matmul %202, %3, %cst_104 {dimension_numbers = #tpu.dot_dimension_numbers<[1], [0], [0], [1], [0, 0, 1, 1], [], []>} : vector<2x32xf32>, vector<32x16xf32>, vector<2x16xf32> -> vector<2x16xf32>
    %cst_105 = arith.constant dense<0.000000e+00> : vector<2x96xf32>
    %204 = tpu.matmul %202, %0, %cst_105 {dimension_numbers = #tpu.dot_dimension_numbers<[1], [0], [0], [1], [0, 0, 1, 1], [], []>} : vector<2x32xf32>, vector<32x96xf32>, vector<2x96xf32> -> vector<2x96xf32>
    %c0_106 = arith.constant 0 : index
    %c6 = arith.constant 6 : index
    %c0_107 = arith.constant 0 : index
    %c0_108 = arith.constant 0 : index
    %205 = vector.load %arg0[%c0_106, %c6, %c0_107, %c0_108] : memref<3x8x2x32xf32, #tpu.memory_space<vmem>>, vector<1x1x2x32xf32>
    %206 = vector.shape_cast %205 : vector<1x1x2x32xf32> to vector<2x32xf32>
    %207 = vector.extract_strided_slice %204 {offsets = [0, 0], sizes = [2, 32], strides = [1, 1]} : vector<2x96xf32> to vector<2x32xf32>
    %208 = arith.addf %206, %207 : vector<2x32xf32>
    %209 = arith.negf %208 : vector<2x32xf32>
    %210 = math.exp %209 : vector<2x32xf32>
    %cst_109 = arith.constant 1.000000e+00 : f32
    %211 = vector.broadcast %cst_109 : f32 to vector<2x32xf32>
    %212 = arith.addf %211, %210 : vector<2x32xf32>
    %213 = arith.divf %211, %212 : vector<2x32xf32>
    %c1_110 = arith.constant 1 : index
    %c6_111 = arith.constant 6 : index
    %c0_112 = arith.constant 0 : index
    %c0_113 = arith.constant 0 : index
    %214 = vector.load %arg0[%c1_110, %c6_111, %c0_112, %c0_113] : memref<3x8x2x32xf32, #tpu.memory_space<vmem>>, vector<1x1x2x32xf32>
    %215 = vector.shape_cast %214 : vector<1x1x2x32xf32> to vector<2x32xf32>
    %216 = vector.extract_strided_slice %204 {offsets = [0, 32], sizes = [2, 32], strides = [1, 1]} : vector<2x96xf32> to vector<2x32xf32>
    %217 = arith.addf %215, %216 : vector<2x32xf32>
    %218 = arith.negf %217 : vector<2x32xf32>
    %219 = math.exp %218 : vector<2x32xf32>
    %cst_114 = arith.constant 1.000000e+00 : f32
    %220 = vector.broadcast %cst_114 : f32 to vector<2x32xf32>
    %221 = arith.addf %220, %219 : vector<2x32xf32>
    %222 = arith.divf %220, %221 : vector<2x32xf32>
    %c2_115 = arith.constant 2 : index
    %c6_116 = arith.constant 6 : index
    %c0_117 = arith.constant 0 : index
    %c0_118 = arith.constant 0 : index
    %223 = vector.load %arg0[%c2_115, %c6_116, %c0_117, %c0_118] : memref<3x8x2x32xf32, #tpu.memory_space<vmem>>, vector<1x1x2x32xf32>
    %224 = vector.shape_cast %223 : vector<1x1x2x32xf32> to vector<2x32xf32>
    %225 = vector.extract_strided_slice %204 {offsets = [0, 64], sizes = [2, 32], strides = [1, 1]} : vector<2x96xf32> to vector<2x32xf32>
    %226 = vector.broadcast %1 : vector<1x32xf32> to vector<2x32xf32>
    %227 = arith.addf %225, %226 : vector<2x32xf32>
    %228 = arith.mulf %213, %227 : vector<2x32xf32>
    %229 = arith.addf %224, %228 : vector<2x32xf32>
    %230 = math.tanh %229 : vector<2x32xf32>
    %cst_119 = arith.constant 1.000000e+00 : f32
    %231 = vector.broadcast %cst_119 : f32 to vector<2x32xf32>
    %232 = arith.subf %231, %222 : vector<2x32xf32>
    %233 = arith.mulf %232, %230 : vector<2x32xf32>
    %234 = arith.mulf %222, %202 : vector<2x32xf32>
    %235 = arith.addf %233, %234 : vector<2x32xf32>
    %cst_120 = arith.constant dense<0.000000e+00> : vector<2x16xf32>
    %236 = tpu.matmul %235, %3, %cst_120 {dimension_numbers = #tpu.dot_dimension_numbers<[1], [0], [0], [1], [0, 0, 1, 1], [], []>} : vector<2x32xf32>, vector<32x16xf32>, vector<2x16xf32> -> vector<2x16xf32>
    %cst_121 = arith.constant dense<0.000000e+00> : vector<2x96xf32>
    %237 = tpu.matmul %235, %0, %cst_121 {dimension_numbers = #tpu.dot_dimension_numbers<[1], [0], [0], [1], [0, 0, 1, 1], [], []>} : vector<2x32xf32>, vector<32x96xf32>, vector<2x96xf32> -> vector<2x96xf32>
    %c0_122 = arith.constant 0 : index
    %c7 = arith.constant 7 : index
    %c0_123 = arith.constant 0 : index
    %c0_124 = arith.constant 0 : index
    %238 = vector.load %arg0[%c0_122, %c7, %c0_123, %c0_124] : memref<3x8x2x32xf32, #tpu.memory_space<vmem>>, vector<1x1x2x32xf32>
    %239 = vector.shape_cast %238 : vector<1x1x2x32xf32> to vector<2x32xf32>
    %240 = vector.extract_strided_slice %237 {offsets = [0, 0], sizes = [2, 32], strides = [1, 1]} : vector<2x96xf32> to vector<2x32xf32>
    %241 = arith.addf %239, %240 : vector<2x32xf32>
    %242 = arith.negf %241 : vector<2x32xf32>
    %243 = math.exp %242 : vector<2x32xf32>
    %cst_125 = arith.constant 1.000000e+00 : f32
    %244 = vector.broadcast %cst_125 : f32 to vector<2x32xf32>
    %245 = arith.addf %244, %243 : vector<2x32xf32>
    %246 = arith.divf %244, %245 : vector<2x32xf32>
    %c1_126 = arith.constant 1 : index
    %c7_127 = arith.constant 7 : index
    %c0_128 = arith.constant 0 : index
    %c0_129 = arith.constant 0 : index
    %247 = vector.load %arg0[%c1_126, %c7_127, %c0_128, %c0_129] : memref<3x8x2x32xf32, #tpu.memory_space<vmem>>, vector<1x1x2x32xf32>
    %248 = vector.shape_cast %247 : vector<1x1x2x32xf32> to vector<2x32xf32>
    %249 = vector.extract_strided_slice %237 {offsets = [0, 32], sizes = [2, 32], strides = [1, 1]} : vector<2x96xf32> to vector<2x32xf32>
    %250 = arith.addf %248, %249 : vector<2x32xf32>
    %251 = arith.negf %250 : vector<2x32xf32>
    %252 = math.exp %251 : vector<2x32xf32>
    %cst_130 = arith.constant 1.000000e+00 : f32
    %253 = vector.broadcast %cst_130 : f32 to vector<2x32xf32>
    %254 = arith.addf %253, %252 : vector<2x32xf32>
    %255 = arith.divf %253, %254 : vector<2x32xf32>
    %c2_131 = arith.constant 2 : index
    %c7_132 = arith.constant 7 : index
    %c0_133 = arith.constant 0 : index
    %c0_134 = arith.constant 0 : index
    %256 = vector.load %arg0[%c2_131, %c7_132, %c0_133, %c0_134] : memref<3x8x2x32xf32, #tpu.memory_space<vmem>>, vector<1x1x2x32xf32>
    %257 = vector.shape_cast %256 : vector<1x1x2x32xf32> to vector<2x32xf32>
    %258 = vector.extract_strided_slice %237 {offsets = [0, 64], sizes = [2, 32], strides = [1, 1]} : vector<2x96xf32> to vector<2x32xf32>
    %259 = vector.broadcast %1 : vector<1x32xf32> to vector<2x32xf32>
    %260 = arith.addf %258, %259 : vector<2x32xf32>
    %261 = arith.mulf %246, %260 : vector<2x32xf32>
    %262 = arith.addf %257, %261 : vector<2x32xf32>
    %263 = math.tanh %262 : vector<2x32xf32>
    %cst_135 = arith.constant 1.000000e+00 : f32
    %264 = vector.broadcast %cst_135 : f32 to vector<2x32xf32>
    %265 = arith.subf %264, %255 : vector<2x32xf32>
    %266 = arith.mulf %265, %263 : vector<2x32xf32>
    %267 = arith.mulf %255, %235 : vector<2x32xf32>
    %268 = arith.addf %266, %267 : vector<2x32xf32>
    %cst_136 = arith.constant dense<0.000000e+00> : vector<2x16xf32>
    %269 = tpu.matmul %268, %2, %cst_136 {dimension_numbers = #tpu.dot_dimension_numbers<[1], [0], [0], [1], [0, 0, 1, 1], [], []>} : vector<2x32xf32>, vector<32x16xf32>, vector<2x16xf32> -> vector<2x16xf32>
    %270 = arith.addf %38, %269 : vector<2x16xf32>
    %271 = math.tanh %270 : vector<2x16xf32>
    %272 = vector.broadcast %4 : vector<1x16xf32> to vector<2x16xf32>
    %273 = arith.mulf %271, %272 : vector<2x16xf32>
    %cst_137 = arith.constant dense<0.000000e+00> : vector<2xf32>
    %274 = vector.multi_reduction <add>, %273, %cst_137 [1] : vector<2x16xf32> to vector<2xf32>
    %275 = vector.shape_cast %274 : vector<2xf32> to vector<2x1xf32>
    %276 = arith.addf %71, %269 : vector<2x16xf32>
    %277 = math.tanh %276 : vector<2x16xf32>
    %278 = vector.broadcast %4 : vector<1x16xf32> to vector<2x16xf32>
    %279 = arith.mulf %277, %278 : vector<2x16xf32>
    %cst_138 = arith.constant dense<0.000000e+00> : vector<2xf32>
    %280 = vector.multi_reduction <add>, %279, %cst_138 [1] : vector<2x16xf32> to vector<2xf32>
    %281 = vector.shape_cast %280 : vector<2xf32> to vector<2x1xf32>
    %282 = arith.addf %104, %269 : vector<2x16xf32>
    %283 = math.tanh %282 : vector<2x16xf32>
    %284 = vector.broadcast %4 : vector<1x16xf32> to vector<2x16xf32>
    %285 = arith.mulf %283, %284 : vector<2x16xf32>
    %cst_139 = arith.constant dense<0.000000e+00> : vector<2xf32>
    %286 = vector.multi_reduction <add>, %285, %cst_139 [1] : vector<2x16xf32> to vector<2xf32>
    %287 = vector.shape_cast %286 : vector<2xf32> to vector<2x1xf32>
    %288 = arith.addf %137, %269 : vector<2x16xf32>
    %289 = math.tanh %288 : vector<2x16xf32>
    %290 = vector.broadcast %4 : vector<1x16xf32> to vector<2x16xf32>
    %291 = arith.mulf %289, %290 : vector<2x16xf32>
    %cst_140 = arith.constant dense<0.000000e+00> : vector<2xf32>
    %292 = vector.multi_reduction <add>, %291, %cst_140 [1] : vector<2x16xf32> to vector<2xf32>
    %293 = vector.shape_cast %292 : vector<2xf32> to vector<2x1xf32>
    %294 = arith.addf %170, %269 : vector<2x16xf32>
    %295 = math.tanh %294 : vector<2x16xf32>
    %296 = vector.broadcast %4 : vector<1x16xf32> to vector<2x16xf32>
    %297 = arith.mulf %295, %296 : vector<2x16xf32>
    %cst_141 = arith.constant dense<0.000000e+00> : vector<2xf32>
    %298 = vector.multi_reduction <add>, %297, %cst_141 [1] : vector<2x16xf32> to vector<2xf32>
    %299 = vector.shape_cast %298 : vector<2xf32> to vector<2x1xf32>
    %300 = arith.addf %203, %269 : vector<2x16xf32>
    %301 = math.tanh %300 : vector<2x16xf32>
    %302 = vector.broadcast %4 : vector<1x16xf32> to vector<2x16xf32>
    %303 = arith.mulf %301, %302 : vector<2x16xf32>
    %cst_142 = arith.constant dense<0.000000e+00> : vector<2xf32>
    %304 = vector.multi_reduction <add>, %303, %cst_142 [1] : vector<2x16xf32> to vector<2xf32>
    %305 = vector.shape_cast %304 : vector<2xf32> to vector<2x1xf32>
    %306 = arith.addf %236, %269 : vector<2x16xf32>
    %307 = math.tanh %306 : vector<2x16xf32>
    %308 = vector.broadcast %4 : vector<1x16xf32> to vector<2x16xf32>
    %309 = arith.mulf %307, %308 : vector<2x16xf32>
    %cst_143 = arith.constant dense<0.000000e+00> : vector<2xf32>
    %310 = vector.multi_reduction <add>, %309, %cst_143 [1] : vector<2x16xf32> to vector<2xf32>
    %311 = vector.shape_cast %310 : vector<2xf32> to vector<2x1xf32>
    %312 = arith.maximumf %275, %281 : vector<2x1xf32>
    %313 = arith.maximumf %312, %287 : vector<2x1xf32>
    %314 = arith.maximumf %313, %293 : vector<2x1xf32>
    %315 = arith.maximumf %314, %299 : vector<2x1xf32>
    %316 = arith.maximumf %315, %305 : vector<2x1xf32>
    %317 = arith.maximumf %316, %311 : vector<2x1xf32>
    %318 = arith.subf %275, %317 : vector<2x1xf32>
    %319 = math.exp %318 : vector<2x1xf32>
    %320 = arith.subf %281, %317 : vector<2x1xf32>
    %321 = math.exp %320 : vector<2x1xf32>
    %322 = arith.subf %287, %317 : vector<2x1xf32>
    %323 = math.exp %322 : vector<2x1xf32>
    %324 = arith.subf %293, %317 : vector<2x1xf32>
    %325 = math.exp %324 : vector<2x1xf32>
    %326 = arith.subf %299, %317 : vector<2x1xf32>
    %327 = math.exp %326 : vector<2x1xf32>
    %328 = arith.subf %305, %317 : vector<2x1xf32>
    %329 = math.exp %328 : vector<2x1xf32>
    %330 = arith.subf %311, %317 : vector<2x1xf32>
    %331 = math.exp %330 : vector<2x1xf32>
    %332 = arith.addf %319, %321 : vector<2x1xf32>
    %333 = arith.addf %332, %323 : vector<2x1xf32>
    %334 = arith.addf %333, %325 : vector<2x1xf32>
    %335 = arith.addf %334, %327 : vector<2x1xf32>
    %336 = arith.addf %335, %329 : vector<2x1xf32>
    %337 = arith.addf %336, %331 : vector<2x1xf32>
    %338 = tpu.reciprocal %337 {approx = true} : vector<2x1xf32> -> vector<2x1xf32>
    %339 = vector.broadcast %319 : vector<2x1xf32> to vector<2x32xf32>
    %340 = arith.mulf %339, %37 : vector<2x32xf32>
    %341 = vector.broadcast %321 : vector<2x1xf32> to vector<2x32xf32>
    %342 = arith.mulf %341, %70 : vector<2x32xf32>
    %343 = arith.addf %340, %342 : vector<2x32xf32>
    %344 = vector.broadcast %323 : vector<2x1xf32> to vector<2x32xf32>
    %345 = arith.mulf %344, %103 : vector<2x32xf32>
    %346 = arith.addf %343, %345 : vector<2x32xf32>
    %347 = vector.broadcast %325 : vector<2x1xf32> to vector<2x32xf32>
    %348 = arith.mulf %347, %136 : vector<2x32xf32>
    %349 = arith.addf %346, %348 : vector<2x32xf32>
    %350 = vector.broadcast %327 : vector<2x1xf32> to vector<2x32xf32>
    %351 = arith.mulf %350, %169 : vector<2x32xf32>
    %352 = arith.addf %349, %351 : vector<2x32xf32>
    %353 = vector.broadcast %329 : vector<2x1xf32> to vector<2x32xf32>
    %354 = arith.mulf %353, %202 : vector<2x32xf32>
    %355 = arith.addf %352, %354 : vector<2x32xf32>
    %356 = vector.broadcast %331 : vector<2x1xf32> to vector<2x32xf32>
    %357 = arith.mulf %356, %235 : vector<2x32xf32>
    %358 = arith.addf %355, %357 : vector<2x32xf32>
    %359 = vector.broadcast %338 : vector<2x1xf32> to vector<2x32xf32>
    %360 = arith.mulf %358, %359 : vector<2x32xf32>
    %c0_144 = arith.constant 0 : index
    %c0_145 = arith.constant 0 : index
    %361 = vector.load %arg5[%c0_144, %c0_145] : memref<64x5xf32, #tpu.memory_space<vmem>>, vector<32x5xf32>
    %cst_146 = arith.constant dense<0.000000e+00> : vector<2x5xf32>
    %362 = tpu.matmul %268, %361, %cst_146 {dimension_numbers = #tpu.dot_dimension_numbers<[1], [0], [0], [1], [0, 0, 1, 1], [], []>} : vector<2x32xf32>, vector<32x5xf32>, vector<2x5xf32> -> vector<2x5xf32>
    %c32_147 = arith.constant 32 : index
    %c0_148 = arith.constant 0 : index
    %363 = vector.load %arg5[%c32_147, %c0_148] : memref<64x5xf32, #tpu.memory_space<vmem>>, vector<32x5xf32>
    %cst_149 = arith.constant dense<0.000000e+00> : vector<2x5xf32>
    %364 = tpu.matmul %360, %363, %cst_149 {dimension_numbers = #tpu.dot_dimension_numbers<[1], [0], [0], [1], [0, 0, 1, 1], [], []>} : vector<2x32xf32>, vector<32x5xf32>, vector<2x5xf32> -> vector<2x5xf32>
    %365 = arith.addf %362, %364 : vector<2x5xf32>
    %c0_150 = arith.constant 0 : index
    %c0_151 = arith.constant 0 : index
    %366 = vector.load %arg6[%c0_150, %c0_151] : memref<1x5xf32, #tpu.memory_space<vmem>>, vector<1x5xf32>
    %367 = vector.broadcast %366 : vector<1x5xf32> to vector<2x5xf32>
    %368 = arith.addf %365, %367 : vector<2x5xf32>
    %c0_152 = arith.constant 0 : index
    %c0_153 = arith.constant 0 : index
    %369 = vector.load %arg7[%c0_152, %c0_153] : memref<2x5xf32, #tpu.memory_space<vmem>>, vector<2x5xf32>
    tpu.vector_store %arg7[%c0_152, %c0_153], %368 {strides = array<i32>} : memref<2x5xf32, #tpu.memory_space<vmem>>, vector<2x5xf32>,
    return
  }
}

</mosaic_0001>

<bundles_post_ra>
// kernel: _dip_c_forward.1
= control target key start
LH: loop header
LB: loop body
LE: loop exit
PB: predicated region body
PF: predicated region fallthrough
CT: control target
= control target key end

     0   :  { %s1566_s0 = inlined_call_operand.vmem [shape: f32[3,8,2,32], index: 0, kind: input, shape index: {}]   ;;  %s1567_s1 = inlined_call_operand.vmem [shape: f32[32,96], index: 1, kind: input, shape index: {}]   ;;  %s1568_s2 = inlined_call_operand.vmem [shape: f32[1,32], index: 2, kind: input, shape index: {}]   ;;  %s1569_s3 = inlined_call_operand.vmem [shape: f32[64,16], index: 3, kind: input, shape index: {}]   ;;  %s1570_s4 = inlined_call_operand.vmem [shape: f32[1,16], index: 4, kind: input, shape index: {}]   ;;  %s1571_s5 = inlined_call_operand.vmem [shape: f32[64,5], index: 5, kind: input, shape index: {}]   ;;  %s1572_s6 = inlined_call_operand.vmem [shape: f32[1,5], index: 6, kind: input, shape index: {}]   ;;  %s1573_s7 = inlined_call_operand.hbm [shape: f32[2,5], index: 7, kind: output, shape index: {}]  }
   0x1   :  { %v30_v0 = vld [vmem:[%s1567_s1 + $0x18] sm:$0xff]  ;;  %v29_v1 = vld [vmem:[%s1567_s1 + $0x10] sm:$0xff]  ;;  %v28_v2 = vld [vmem:[%s1567_s1 + $0x8] sm:$0xff] }
   0x2   :  { %57 = vmatpush.msra.mxu0 %v30_v0  ;;  %v1110_v3 = vld [vmem:[%s1568_s2] ss:$0 sm:$0xff]  ;;  %146 = vmatpush.msra.mxu1 %v30_v0 }
   0x3   :  { %231 = vmatpush.msra.mxu2 %v30_v0  ;;  %316 = vmatpush.msra.mxu3 %v30_v0 }
   0x4   :  { %12 = vsyncpa [#allocation3], 0  ;;  %58 = vmatpush.msra.mxu0 %v29_v1  ;;  %s1249_s9 = smov 64   ;;  %v27_v4 = vld [vmem:[%s1567_s1] sm:$0xff]  ;;  %147 = vmatpush.msra.mxu1 %v29_v1  ;;  %v1250_v5 = vmov 0.0   ;;  %s1251_s1 = smov 96  }
   0x5   :  { %116 = vrot.lane.b32.xlu0 %v1110_v3, %s1249_s9  ;;  %232 = vmatpush.msra.mxu2 %v29_v1  ;;  %v65_v9 = vld [vmem:[%s1566_s0] sm:$0x3]  ;;  %v1051_v15 = vld [vmem:[%s1566_s0 + $0x10] sm:$0x3]  ;;  %vm41_vm8 = vcmask 261120   ;;  %s1252_s20 = smov [#allocation2]  }
   0x6   :  { %59 = vmatpush.msra.mxu0 %v28_v2  ;;  %317 = vmatpush.msra.mxu3 %v29_v1  ;;  %v1053_v32 = vld [vmem:[%s1566_s0 + $0x20] sm:$0x3]  ;;  %v1055_v51 = vld [vmem:[%s1566_s0 + $0x2] sm:$0x3]  ;;  %v1057_v58 = vld [vmem:[%s1566_s0 + $0x12] sm:$0x3] }
   0x7   :  { %148 = vmatpush.msra.mxu1 %v28_v2  ;;  %233 = vmatpush.msra.mxu2 %v28_v2  ;;  %s1041_s22 = sshll.u32 %s1573_s7, 4  ;;  %s1042_s22 = int_to_ptr.hbm [resolvable:$true] %s1041_s22 }
   0x8   :  { %60 = vmatpush.msra.mxu0 %v27_v4  ;;  %318 = vmatpush.msra.mxu3 %v28_v2 }
   0x9   :  { %61 = vmatmul.f32.vlgmr.msra.gmra.mxu0 %v1250_v5  ;;  %149 = vmatpush.msra.mxu1 %v27_v4 }
   0xa   :  { %234 = vmatpush.msra.mxu2 %v27_v4  ;;  %319 = vmatpush.msra.mxu3 %v27_v4 }
   0xb   :  { %401 = vmatpush.msrb.mxu0 %v30_v0  ;;  %486 = vmatpush.msrb.mxu1 %v30_v0 }
   0xc   :  { %571 = vmatpush.msrb.mxu2 %v30_v0  ;;  %656 = vmatpush.msrb.mxu3 %v30_v0 }
   0xd   :  { %402 = vmatpush.msrb.mxu0 %v29_v1  ;;  %487 = vmatpush.msrb.mxu1 %v29_v1 }
   0xe   :  { %572 = vmatpush.msrb.mxu2 %v29_v1  ;;  %657 = vmatpush.msrb.mxu3 %v29_v1 }
   0xf   :  { %403 = vmatpush.msrb.mxu0 %v28_v2  ;;  %488 = vmatpush.msrb.mxu1 %v28_v2 }
  0x10   :  { %573 = vmatpush.msrb.mxu2 %v28_v2  ;;  %658 = vmatpush.msrb.mxu3 %v28_v2 }
  0x11   :  { %404 = vmatpush.msrb.mxu0 %v27_v4  ;;  %489 = vmatpush.msrb.mxu1 %v27_v4 }
  0x12   :  { %574 = vmatpush.msrb.mxu2 %v27_v4  ;;  %659 = vmatpush.msrb.mxu3 %v27_v4 }
  0x77   :  { %v1309_v6 = vpop.permute.xlu0 %116 }
  0x86   :  { %v62_v7 = vpop.f32.mrf.mxu0 }
  0x87   :  { %89 = vrot.lane.b32.xlu0 %v62_v7, %s1251_s1  ;;  %v119_v8 = vadd.f32 %v1309_v6, %v62_v7  ;;  %v66_v10 = vadd.f32 %v65_v9, %v62_v7 }
  0x89   :  { %121 = vrot.lane.b32.xlu1 %v119_v8, %s1249_s9  ;;  %v1050_v11 = vmul.f32 -1.442695, %v66_v10 }
  0x8b   :  { %1113 = vpow2.f32 %v1050_v11  ;;  %v1059_v11 = vld [vmem:[%s1566_s0 + $0x22] sm:$0x3] }
  0x91   :  { %v1114_v12 = vpop.eup %1113 }
  0x92   :  { %v70_v13 = vadd.f32 1.0, %v1114_v12 }
  0x94   :  { %1115 = vrcp.f32 %v70_v13  ;;  %v82_v24 = vand.u32 2147483648, %v70_v13  ;;  %vm76_vm1 = vweird.f32 %v70_v13  ;;  %v80_v26 = vand.u32 2147483647, %v70_v13 }
  0x96   :  { %v83_v29 = vor.u32 1.1754944e-38, %v82_v24  ;;  %vm81_vm3 = vcmp.eq.f32.partialorder %v80_v26, 8.507059e+37 }
  0x9a   :  { %v1116_v14 = vpop.eup %1115 }
  0x9b   :  { %v72_v16 = vmul.f32 %v1116_v14, %v70_v13  ;;  %vm77_vm0 = vweird.f32 %v1116_v14 }
  0x9c   :  { %vm78_vm2 = vmor %vm76_vm1, %vm77_vm0 }
  0x9d   :  { %v73_v19 = vsub.f32 1.0, %v72_v16 }
  0x9f   :  { %v74_v21 = vmul.f32 %v1116_v14, %v73_v19 }
  0xa1   :  { %v75_v22 = vadd.f32 %v1116_v14, %v74_v21 }
  0xa3   :  { %v79_v27 = vsel %vm78_vm2, %v1116_v14, %v75_v22 }
  0xa4   :  { %v84_v30 = vsel %vm81_vm3, %v83_v29, %v79_v27 }
  0xf9   :  { %v90_v17 = vpop.permute.xlu0 %89 }
  0xfa   :  { %v92_v18 = vadd.f32 %v1051_v15, %v90_v17 }
  0xfb   :  { %v122_v28 = vpop.permute.xlu1 %121 }
  0xfc   :  { %v1052_v20 = vmul.f32 -1.442695, %v92_v18  ;;  %v124_v31 = vmul.f32 %v122_v28, %v84_v30  ;;  %v1061_v30 = vld [vmem:[%s1566_s0 + $0x4] sm:$0x3] }
  0xfe   :  { %1117 = vpow2.f32 %v1052_v20  ;;  %v125_v35 = vadd.f32 %v1053_v32, %v124_v31 }
 0x104   :  { %v1118_v23 = vpop.eup %1117 }
 0x105   :  { %v96_v25 = vadd.f32 1.0, %v1118_v23 }
 0x107   :  { %1119 = vrcp.f32 %v96_v25  ;;  %v108_v37 = vand.u32 2147483648, %v96_v25  ;;  %v106_v39 = vand.u32 2147483647, %v96_v25  ;;  %vm102_vm5 = vweird.f32 %v96_v25 }
 0x108   :  { %1121 = vtanh.f32 %v125_v35  ;;  %v1063_v35 = vld [vmem:[%s1566_s0 + $0x14] sm:$0x3] }
 0x109   :  { %v109_v41 = vor.u32 1.1754944e-38, %v108_v37  ;;  %vm107_vm7 = vcmp.eq.f32.partialorder %v106_v39, 8.507059e+37 }
 0x10d   :  { %v1120_v33 = vpop.eup %1119 }
 0x10e   :  { %v98_v34 = vmul.f32 %v1120_v33, %v96_v25  ;;  %vm103_vm4 = vweird.f32 %v1120_v33  ;;  %v1122_v45 = vpop.eup %1121 }
 0x10f   :  { %vm104_vm6 = vmor %vm102_vm5, %vm103_vm4 }
 0x110   :  { %v99_v36 = vsub.f32 1.0, %v98_v34 }
 0x112   :  { %v100_v38 = vmul.f32 %v1120_v33, %v99_v36 }
 0x114   :  { %v101_v40 = vadd.f32 %v1120_v33, %v100_v38 }
 0x116   :  { %v105_v42 = vsel %vm104_vm6, %v1120_v33, %v101_v40 }
 0x117   :  { %v110_v43 = vsel %vm107_vm7, %v109_v41, %v105_v42 }
 0x118   :  { %v127_v44 = vsub.f32 1.0, %v110_v43  ;;  %v129_v47 = vmul.f32 0.0, %v110_v43 }
 0x11a   :  { %v128_v46 = vmul.f32 %v1122_v45, %v127_v44 }
 0x11c   :  { %v1323_v48 = vadd.f32 %v129_v47, %v128_v46 }
 0x11e   :  { %1054 = vmatmul.msk.f32.vlgmr.msra.gmra.mxu1 %vm41_vm8, %v1323_v48 }
 0x19b   :  { %v151_v49 = vpop.f32.mrf.mxu1 }
 0x19c   :  { %179 = vrot.lane.b32.xlu1 %v151_v49, %s1251_s1  ;;  %v204_v50 = vadd.f32 %v151_v49, %v1309_v6  ;;  %v156_v52 = vadd.f32 %v1055_v51, %v151_v49 }
 0x19e   :  { %206 = vrot.lane.b32.xlu2 %v204_v50, %s1249_s9  ;;  %v1056_v53 = vmul.f32 -1.442695, %v156_v52 }
 0x1a0   :  { %1123 = vpow2.f32 %v1056_v53 }
 0x1a6   :  { %v1124_v54 = vpop.eup %1123 }
 0x1a7   :  { %v160_v55 = vadd.f32 1.0, %v1124_v54 }
 0x1a9   :  { %1125 = vrcp.f32 %v160_v55  ;;  %v172_v2 = vand.u32 2147483648, %v160_v55  ;;  %vm166_vm10 = vweird.f32 %v160_v55  ;;  %v170_v3 = vand.u32 2147483647, %v160_v55 }
 0x1ab   :  { %v173_v8 = vor.u32 1.1754944e-38, %v172_v2  ;;  %vm171_vm12 = vcmp.eq.f32.partialorder %v170_v3, 8.507059e+37 }
 0x1af   :  { %v1126_v56 = vpop.eup %1125 }
 0x1b0   :  { %v162_v57 = vmul.f32 %v1126_v56, %v160_v55  ;;  %vm167_vm9 = vweird.f32 %v1126_v56  ;;  %v1065_v55 = vld [vmem:[%s1566_s0 + $0x24] sm:$0x3] }
 0x1b1   :  { %vm168_vm11 = vmor %vm166_vm10, %vm167_vm9 }
 0x1b2   :  { %v163_v61 = vsub.f32 1.0, %v162_v57 }
 0x1b4   :  { %v164_v63 = vmul.f32 %v1126_v56, %v163_v61 }
 0x1b6   :  { %v165_v0 = vadd.f32 %v1126_v56, %v164_v63 }
 0x1b8   :  { %v169_v5 = vsel %vm168_vm11, %v1126_v56, %v165_v0 }
 0x1b9   :  { %v174_v9 = vsel %vm171_vm12, %v173_v8, %v169_v5 }
 0x1f8   :  { %v207_v7 = vpop.permute.xlu2 %206 }
 0x1f9   :  { %v209_v10 = vmul.f32 %v207_v7, %v174_v9 }
 0x1fb   :  { %v210_v14 = vadd.f32 %v1059_v11, %v209_v10  ;;  %v1067_v10 = vld [vmem:[%s1566_s0 + $0x6] sm:$0x3] }
 0x20e   :  { %v180_v59 = vpop.permute.xlu1 %179 }
 0x20f   :  { %v182_v60 = vadd.f32 %v1057_v58, %v180_v59 }
 0x211   :  { %v1058_v62 = vmul.f32 -1.442695, %v182_v60 }
 0x213   :  { %1127 = vpow2.f32 %v1058_v62 }
 0x219   :  { %v1128_v1 = vpop.eup %1127 }
 0x21a   :  { %v186_v4 = vadd.f32 1.0, %v1128_v1 }
 0x21c   :  { %1129 = vrcp.f32 %v186_v4  ;;  %v198_v16 = vand.u32 2147483648, %v186_v4  ;;  %v196_v18 = vand.u32 2147483647, %v186_v4  ;;  %vm192_vm14 = vweird.f32 %v186_v4 }
 0x21d   :  { %1131 = vtanh.f32 %v210_v14 }
 0x21e   :  { %v199_v20 = vor.u32 1.1754944e-38, %v198_v16  ;;  %vm197_vm0 = vcmp.eq.f32.partialorder %v196_v18, 8.507059e+37 }
 0x222   :  { %v1130_v12 = vpop.eup %1129 }
 0x223   :  { %v188_v13 = vmul.f32 %v1130_v12, %v186_v4  ;;  %vm193_vm13 = vweird.f32 %v1130_v12  ;;  %v1132_v24 = vpop.eup %1131 }
 0x224   :  { %vm194_vm15 = vmor %vm192_vm14, %vm193_vm13 }
 0x225   :  { %v189_v15 = vsub.f32 1.0, %v188_v13 }
 0x227   :  { %v190_v17 = vmul.f32 %v1130_v12, %v189_v15 }
 0x229   :  { %v191_v19 = vadd.f32 %v1130_v12, %v190_v17  ;;  %v1069_v17 = vld [vmem:[%s1566_s0 + $0x16] sm:$0x3] }
 0x22b   :  { %v195_v21 = vsel %vm194_vm15, %v1130_v12, %v191_v19 }
 0x22c   :  { %v200_v22 = vsel %vm197_vm0, %v199_v20, %v195_v21 }
 0x22d   :  { %v212_v23 = vsub.f32 1.0, %v200_v22  ;;  %v214_v26 = vmul.f32 %v200_v22, %v1323_v48 }
 0x22f   :  { %v213_v25 = vmul.f32 %v1132_v24, %v212_v23 }
 0x231   :  { %v1340_v27 = vadd.f32 %v214_v26, %v213_v25 }
 0x233   :  { %1060 = vmatmul.msk.f32.vlgmr.msra.gmra.mxu2 %vm41_vm8, %v1340_v27 }
 0x2b6   :  { %v236_v28 = vpop.f32.mrf.mxu2 }
 0x2b7   :  { %v289_v29 = vadd.f32 %v236_v28, %v1309_v6  ;;  %264 = vrot.lane.b32.xlu2 %v236_v28, %s1251_s1  ;;  %v241_v31 = vadd.f32 %v1061_v30, %v236_v28 }
 0x2b9   :  { %291 = vrot.lane.b32.xlu0 %v289_v29, %s1249_s9  ;;  %v1062_v32 = vmul.f32 -1.442695, %v241_v31 }
 0x2bb   :  { %1133 = vpow2.f32 %v1062_v32 }
 0x2c1   :  { %v1134_v33 = vpop.eup %1133 }
 0x2c2   :  { %v245_v34 = vadd.f32 1.0, %v1134_v33 }
 0x2c4   :  { %1135 = vrcp.f32 %v245_v34  ;;  %v257_v47 = vand.u32 2147483648, %v245_v34  ;;  %vm251_vm2 = vweird.f32 %v245_v34  ;;  %v255_v50 = vand.u32 2147483647, %v245_v34 }
 0x2c6   :  { %v258_v53 = vor.u32 1.1754944e-38, %v257_v47  ;;  %vm256_vm4 = vcmp.eq.f32.partialorder %v255_v50, 8.507059e+37 }
 0x2ca   :  { %v1136_v39 = vpop.eup %1135 }
 0x2cb   :  { %v247_v40 = vmul.f32 %v1136_v39, %v245_v34  ;;  %vm252_vm1 = vweird.f32 %v1136_v39  ;;  %v1071_v34 = vld [vmem:[%s1566_s0 + $0x26] sm:$0x3] }
 0x2cc   :  { %vm253_vm3 = vmor %vm251_vm2, %vm252_vm1 }
 0x2cd   :  { %v248_v42 = vsub.f32 1.0, %v247_v40 }
 0x2cf   :  { %v249_v44 = vmul.f32 %v1136_v39, %v248_v42 }
 0x2d1   :  { %v250_v45 = vadd.f32 %v1136_v39, %v249_v44 }
 0x2d3   :  { %v254_v52 = vsel %vm253_vm3, %v1136_v39, %v250_v45 }
 0x2d4   :  { %v259_v57 = vsel %vm256_vm4, %v258_v53, %v254_v52 }
 0x311   :  { %v265_v36 = vpop.permute.xlu2 %264 }
 0x312   :  { %v267_v37 = vadd.f32 %v1063_v35, %v265_v36 }
 0x314   :  { %v1064_v38 = vmul.f32 -1.442695, %v267_v37 }
 0x316   :  { %1137 = vpow2.f32 %v1064_v38 }
 0x31c   :  { %v1138_v41 = vpop.eup %1137 }
 0x31d   :  { %v271_v43 = vadd.f32 1.0, %v1138_v41 }
 0x31f   :  { %1139 = vrcp.f32 %v271_v43  ;;  %v283_v60 = vand.u32 2147483648, %v271_v43  ;;  %vm277_vm6 = vweird.f32 %v271_v43  ;;  %v281_v61 = vand.u32 2147483647, %v271_v43 }
 0x321   :  { %v284_v0 = vor.u32 1.1754944e-38, %v283_v60  ;;  %vm282_vm9 = vcmp.eq.f32.partialorder %v281_v61, 8.507059e+37  ;;  %v1075_v60 = vld [vmem:[%s1566_s0 + $0x18] sm:$0x3] }
 0x325   :  { %v1140_v46 = vpop.eup %1139 }
 0x326   :  { %v273_v49 = vmul.f32 %v1140_v46, %v271_v43  ;;  %vm278_vm5 = vweird.f32 %v1140_v46 }
 0x327   :  { %vm279_vm7 = vmor %vm277_vm6, %vm278_vm5 }
 0x328   :  { %v274_v51 = vsub.f32 1.0, %v273_v49 }
 0x32a   :  { %v275_v54 = vmul.f32 %v1140_v46, %v274_v51 }
 0x32b   :  { %v292_v56 = vpop.permute.xlu0 %291 }
 0x32c   :  { %v294_v58 = vmul.f32 %v292_v56, %v259_v57  ;;  %v276_v59 = vadd.f32 %v1140_v46, %v275_v54  ;;  %v1073_v54 = vld [vmem:[%s1566_s0 + $0x8] sm:$0x3] }
 0x32e   :  { %v295_v62 = vadd.f32 %v1065_v55, %v294_v58  ;;  %v280_v63 = vsel %vm279_vm7, %v1140_v46, %v276_v59 }
 0x32f   :  { %v285_v1 = vsel %vm282_vm9, %v284_v0, %v280_v63 }
 0x330   :  { %1141 = vtanh.f32 %v295_v62  ;;  %v297_v2 = vsub.f32 1.0, %v285_v1  ;;  %v299_v5 = vmul.f32 %v285_v1, %v1340_v27 }
 0x336   :  { %v1142_v3 = vpop.eup %1141 }
 0x337   :  { %v298_v4 = vmul.f32 %v1142_v3, %v297_v2  ;;  %v1390_v2 = vld [vmem:[%s1569_s3 + $0x38] sm:$0xff]  ;;  %v1395_v3 = vld [vmem:[%s1569_s3 + $0x30] sm:$0xff] }
 0x338   :  { %761 = vmatpush.msra.mxu1 %v1390_v2  ;;  %790 = vmatpush.msra.mxu2 %v1390_v2 }
 0x339   :  { %v1357_v7 = vadd.f32 %v299_v5, %v298_v4  ;;  %v1402_v5 = vld [vmem:[%s1569_s3 + $0x28] sm:$0xff] }
 0x33a   :  { %762 = vmatpush.msra.mxu1 %v1395_v3  ;;  %791 = vmatpush.msra.mxu2 %v1395_v3 }
 0x33b   :  { %1066 = vmatmul.msk.f32.vlgmr.msra.gmra.mxu3 %vm41_vm8, %v1357_v7 }
 0x33c   :  { %815 = vmatpush.msra.mxu3 %v1390_v2  ;;  %763 = vmatpush.msra.mxu1 %v1402_v5 }
 0x33d   :  { %792 = vmatpush.msra.mxu2 %v1402_v5 }
 0x33e   :  { %816 = vmatpush.msra.mxu3 %v1395_v3 }
 0x340   :  { %817 = vmatpush.msra.mxu3 %v1402_v5 }
 0x3be   :  { %v321_v8 = vpop.f32.mrf.mxu3 }
 0x3bf   :  { %v374_v9 = vadd.f32 %v321_v8, %v1309_v6  ;;  %349 = vrot.lane.b32.xlu1 %v321_v8, %s1251_s1  ;;  %v326_v11 = vadd.f32 %v1067_v10, %v321_v8  ;;  %v1410_v8 = vld [vmem:[%s1569_s3 + $0x20] sm:$0xff] }
 0x3c0   :  { %764 = vmatpush.msra.mxu1 %v1410_v8  ;;  %793 = vmatpush.msra.mxu2 %v1410_v8 }
 0x3c1   :  { %376 = vrot.lane.b32.xlu2 %v374_v9, %s1249_s9  ;;  %v1068_v12 = vmul.f32 -1.442695, %v326_v11  ;;  %818 = vmatpush.msra.mxu3 %v1410_v8 }
 0x3c3   :  { %1143 = vpow2.f32 %v1068_v12 }
 0x3c9   :  { %v1144_v13 = vpop.eup %1143 }
 0x3ca   :  { %v330_v14 = vadd.f32 1.0, %v1144_v13 }
 0x3cc   :  { %1145 = vrcp.f32 %v330_v14  ;;  %v342_v25 = vand.u32 2147483648, %v330_v14  ;;  %vm336_vm11 = vweird.f32 %v330_v14  ;;  %v340_v26 = vand.u32 2147483647, %v330_v14 }
 0x3ce   :  { %v343_v31 = vor.u32 1.1754944e-38, %v342_v25  ;;  %vm341_vm13 = vcmp.eq.f32.partialorder %v340_v26, 8.507059e+37 }
 0x3d2   :  { %v1146_v15 = vpop.eup %1145 }
 0x3d3   :  { %v332_v16 = vmul.f32 %v1146_v15, %v330_v14  ;;  %vm337_vm10 = vweird.f32 %v1146_v15 }
 0x3d4   :  { %vm338_vm12 = vmor %vm336_vm11, %vm337_vm10 }
 0x3d5   :  { %v333_v20 = vsub.f32 1.0, %v332_v16 }
 0x3d7   :  { %v334_v22 = vmul.f32 %v1146_v15, %v333_v20 }
 0x3d9   :  { %v335_v23 = vadd.f32 %v1146_v15, %v334_v22 }
 0x3db   :  { %v339_v29 = vsel %vm338_vm12, %v1146_v15, %v335_v23 }
 0x3dc   :  { %v344_v32 = vsel %vm341_vm13, %v343_v31, %v339_v29 }
 0x41b   :  { %v377_v30 = vpop.permute.xlu2 %376 }
 0x41c   :  { %v379_v33 = vmul.f32 %v377_v30, %v344_v32 }
 0x41e   :  { %v380_v37 = vadd.f32 %v1071_v34, %v379_v33 }
 0x431   :  { %v350_v18 = vpop.permute.xlu1 %349 }
 0x432   :  { %v352_v19 = vadd.f32 %v1069_v17, %v350_v18 }
 0x434   :  { %v1070_v21 = vmul.f32 -1.442695, %v352_v19  ;;  %v1077_v19 = vld [vmem:[%s1566_s0 + $0x28] sm:$0x3] }
 0x436   :  { %1147 = vpow2.f32 %v1070_v21 }
 0x43c   :  { %v1148_v24 = vpop.eup %1147 }
 0x43d   :  { %v356_v28 = vadd.f32 1.0, %v1148_v24 }
 0x43f   :  { %1149 = vrcp.f32 %v356_v28  ;;  %v368_v39 = vand.u32 2147483648, %v356_v28  ;;  %v366_v41 = vand.u32 2147483647, %v356_v28  ;;  %vm362_vm15 = vweird.f32 %v356_v28 }
 0x440   :  { %1151 = vtanh.f32 %v380_v37 }
 0x441   :  { %v369_v43 = vor.u32 1.1754944e-38, %v368_v39  ;;  %vm367_vm1 = vcmp.eq.f32.partialorder %v366_v41, 8.507059e+37  ;;  %v1079_v39 = vld [vmem:[%s1566_s0 + $0xa] sm:$0x3] }
 0x445   :  { %v1150_v35 = vpop.eup %1149 }
 0x446   :  { %v358_v36 = vmul.f32 %v1150_v35, %v356_v28  ;;  %vm363_vm14 = vweird.f32 %v1150_v35  ;;  %v1152_v47 = vpop.eup %1151 }
 0x447   :  { %vm364_vm0 = vmor %vm362_vm15, %vm363_vm14 }
 0x448   :  { %v359_v38 = vsub.f32 1.0, %v358_v36 }
 0x44a   :  { %v360_v40 = vmul.f32 %v1150_v35, %v359_v38 }
 0x44c   :  { %v361_v42 = vadd.f32 %v1150_v35, %v360_v40 }
 0x44e   :  { %v365_v44 = vsel %vm364_vm0, %v1150_v35, %v361_v42 }
 0x44f   :  { %v370_v45 = vsel %vm367_vm1, %v369_v43, %v365_v44  ;;  %v1081_v44 = vld [vmem:[%s1566_s0 + $0x1a] sm:$0x3] }
 0x450   :  { %v382_v46 = vsub.f32 1.0, %v370_v45  ;;  %v384_v50 = vmul.f32 %v370_v45, %v1357_v7 }
 0x452   :  { %v383_v49 = vmul.f32 %v1152_v47, %v382_v46 }
 0x454   :  { %v1374_v51 = vadd.f32 %v384_v50, %v383_v49 }
 0x456   :  { %1072 = vmatmul.msk.f32.vlgmr.msrb.gmra.mxu0 %vm41_vm8, %v1374_v51 }
 0x4d3   :  { %v406_v52 = vpop.f32.mrf.mxu0 }
 0x4d4   :  { %v459_v53 = vadd.f32 %v406_v52, %v1309_v6  ;;  %434 = vrot.lane.b32.xlu0 %v406_v52, %s1251_s1  ;;  %v411_v55 = vadd.f32 %v1073_v54, %v406_v52 }
 0x4d6   :  { %461 = vrot.lane.b32.xlu1 %v459_v53, %s1249_s9  ;;  %v1074_v56 = vmul.f32 -1.442695, %v411_v55 }
 0x4d8   :  { %1153 = vpow2.f32 %v1074_v56 }
 0x4de   :  { %v1154_v57 = vpop.eup %1153 }
 0x4df   :  { %v415_v58 = vadd.f32 1.0, %v1154_v57 }
 0x4e1   :  { %1155 = vrcp.f32 %v415_v58  ;;  %v427_v11 = vand.u32 2147483648, %v415_v58  ;;  %vm421_vm3 = vweird.f32 %v415_v58  ;;  %v425_v13 = vand.u32 2147483647, %v415_v58 }
 0x4e3   :  { %v428_v16 = vor.u32 1.1754944e-38, %v427_v11  ;;  %vm426_vm5 = vcmp.eq.f32.partialorder %v425_v13, 8.507059e+37 }
 0x4e7   :  { %v1156_v59 = vpop.eup %1155 }
 0x4e8   :  { %v417_v61 = vmul.f32 %v1156_v59, %v415_v58  ;;  %vm422_vm2 = vweird.f32 %v1156_v59 }
 0x4e9   :  { %vm423_vm4 = vmor %vm421_vm3, %vm422_vm2 }
 0x4ea   :  { %v418_v0 = vsub.f32 1.0, %v417_v61 }
 0x4ec   :  { %v419_v4 = vmul.f32 %v1156_v59, %v418_v0 }
 0x4ee   :  { %v420_v9 = vadd.f32 %v1156_v59, %v419_v4 }
 0x4f0   :  { %v424_v14 = vsel %vm423_vm4, %v1156_v59, %v420_v9 }
 0x4f1   :  { %v429_v17 = vsel %vm426_vm5, %v428_v16, %v424_v14 }
 0x546   :  { %v435_v62 = vpop.permute.xlu0 %434 }
 0x547   :  { %v437_v63 = vadd.f32 %v1075_v60, %v435_v62 }
 0x548   :  { %v462_v15 = vpop.permute.xlu1 %461 }
 0x549   :  { %v1076_v1 = vmul.f32 -1.442695, %v437_v63  ;;  %v464_v18 = vmul.f32 %v462_v15, %v429_v17 }
 0x54b   :  { %1157 = vpow2.f32 %v1076_v1  ;;  %v465_v22 = vadd.f32 %v1077_v19, %v464_v18  ;;  %v1083_v1 = vld [vmem:[%s1566_s0 + $0x2a] sm:$0x3] }
 0x551   :  { %v1158_v10 = vpop.eup %1157 }
 0x552   :  { %v441_v12 = vadd.f32 1.0, %v1158_v10 }
 0x554   :  { %1159 = vrcp.f32 %v441_v12  ;;  %v453_v24 = vand.u32 2147483648, %v441_v12  ;;  %v451_v26 = vand.u32 2147483647, %v441_v12  ;;  %vm447_vm7 = vweird.f32 %v441_v12 }
 0x555   :  { %1161 = vtanh.f32 %v465_v22 }
 0x556   :  { %v454_v29 = vor.u32 1.1754944e-38, %v453_v24  ;;  %vm452_vm10 = vcmp.eq.f32.partialorder %v451_v26, 8.507059e+37 }
 0x55a   :  { %v1160_v20 = vpop.eup %1159 }
 0x55b   :  { %v443_v21 = vmul.f32 %v1160_v20, %v441_v12  ;;  %vm448_vm6 = vweird.f32 %v1160_v20  ;;  %v1162_v33 = vpop.eup %1161 }
 0x55c   :  { %vm449_vm9 = vmor %vm447_vm7, %vm448_vm6 }
 0x55d   :  { %v444_v23 = vsub.f32 1.0, %v443_v21 }
 0x55f   :  { %v445_v25 = vmul.f32 %v1160_v20, %v444_v23 }
 0x561   :  { %v446_v28 = vadd.f32 %v1160_v20, %v445_v25  ;;  %v1085_v25 = vld [vmem:[%s1566_s0 + $0xc] sm:$0x3] }
 0x563   :  { %v450_v30 = vsel %vm449_vm9, %v1160_v20, %v446_v28 }
 0x564   :  { %v455_v31 = vsel %vm452_vm10, %v454_v29, %v450_v30 }
 0x565   :  { %v467_v32 = vsub.f32 1.0, %v455_v31  ;;  %v469_v35 = vmul.f32 %v455_v31, %v1374_v51 }
 0x567   :  { %v468_v34 = vmul.f32 %v1162_v33, %v467_v32  ;;  %v1087_v33 = vld [vmem:[%s1566_s0 + $0x1c] sm:$0x3] }
 0x569   :  { %v1423_v36 = vadd.f32 %v469_v35, %v468_v34 }
 0x56b   :  { %1078 = vmatmul.msk.f32.vlgmr.msrb.gmra.mxu1 %vm41_vm8, %v1423_v36 }
 0x56c   :  { %865 = vmatpush.msrb.mxu1 %v1390_v2 }
 0x56e   :  { %866 = vmatpush.msrb.mxu1 %v1395_v3 }
 0x570   :  { %867 = vmatpush.msrb.mxu1 %v1402_v5 }
 0x572   :  { %868 = vmatpush.msrb.mxu1 %v1410_v8 }
 0x573   :  { %1097 = vmatmul.msk.f32.vlgmr.msra.gmra.mxu1 %vm41_vm8, %v1323_v48 }
 0x57b   :  { %1101 = vmatmul.msk.f32.vlgmr.msrb.gmra.mxu1 %vm41_vm8, %v1423_v36 }
 0x5e8   :  { %v491_v37 = vpop.f32.mrf.mxu1 }
 0x5e9   :  { %v544_v38 = vadd.f32 %v491_v37, %v1309_v6  ;;  %519 = vrot.lane.b32.xlu2 %v491_v37, %s1251_s1  ;;  %v496_v40 = vadd.f32 %v1079_v39, %v491_v37 }
 0x5eb   :  { %546 = vrot.lane.b32.xlu0 %v544_v38, %s1249_s9  ;;  %v1080_v41 = vmul.f32 -1.442695, %v496_v40 }
 0x5ed   :  { %1163 = vpow2.f32 %v1080_v41 }
 0x5f3   :  { %v1164_v42 = vpop.eup %1163 }
 0x5f4   :  { %v500_v43 = vadd.f32 1.0, %v1164_v42 }
 0x5f6   :  { %1165 = vrcp.f32 %v500_v43  ;;  %v512_v58 = vand.u32 2147483648, %v500_v43  ;;  %vm506_vm12 = vweird.f32 %v500_v43  ;;  %v510_v60 = vand.u32 2147483647, %v500_v43 }
 0x5f8   :  { %v513_v63 = vor.u32 1.1754944e-38, %v512_v58  ;;  %vm511_vm14 = vcmp.eq.f32.partialorder %v510_v60, 8.507059e+37 }
 0x5fc   :  { %v1166_v49 = vpop.eup %1165 }
 0x5fd   :  { %v502_v50 = vmul.f32 %v1166_v49, %v500_v43  ;;  %vm507_vm11 = vweird.f32 %v1166_v49 }
 0x5fe   :  { %vm508_vm13 = vmor %vm506_vm12, %vm507_vm11 }
 0x5ff   :  { %v503_v53 = vsub.f32 1.0, %v502_v50 }
 0x601   :  { %v504_v55 = vmul.f32 %v1166_v49, %v503_v53 }
 0x603   :  { %v505_v56 = vadd.f32 %v1166_v49, %v504_v55 }
 0x605   :  { %v509_v62 = vsel %vm508_vm13, %v1166_v49, %v505_v56 }
 0x606   :  { %v514_v9 = vsel %vm511_vm14, %v513_v63, %v509_v62 }
 0x643   :  { %v520_v45 = vpop.permute.xlu2 %519 }
 0x644   :  { %v522_v46 = vadd.f32 %v1081_v44, %v520_v45 }
 0x646   :  { %v1082_v47 = vmul.f32 -1.442695, %v522_v46 }
 0x648   :  { %1167 = vpow2.f32 %v1082_v47 }
 0x64e   :  { %v1168_v52 = vpop.eup %1167 }
 0x64f   :  { %v526_v54 = vadd.f32 1.0, %v1168_v52  ;;  %v1089_v52 = vld [vmem:[%s1566_s0 + $0x2c] sm:$0x3] }
 0x651   :  { %1169 = vrcp.f32 %v526_v54  ;;  %v538_v12 = vand.u32 2147483648, %v526_v54  ;;  %vm532_vm0 = vweird.f32 %v526_v54  ;;  %v536_v13 = vand.u32 2147483647, %v526_v54 }
 0x653   :  { %v539_v16 = vor.u32 1.1754944e-38, %v538_v12  ;;  %vm537_vm2 = vcmp.eq.f32.partialorder %v536_v13, 8.507059e+37  ;;  %v1091_v13 = vld [vmem:[%s1566_s0 + $0xe] sm:$0x3] }
 0x657   :  { %v1170_v57 = vpop.eup %1169 }
 0x658   :  { %v528_v59 = vmul.f32 %v1170_v57, %v526_v54  ;;  %vm533_vm15 = vweird.f32 %v1170_v57 }
 0x659   :  { %vm534_vm1 = vmor %vm532_vm0, %vm533_vm15 }
 0x65a   :  { %v529_v61 = vsub.f32 1.0, %v528_v59 }
 0x65c   :  { %v530_v0 = vmul.f32 %v1170_v57, %v529_v61 }
 0x65d   :  { %v547_v4 = vpop.permute.xlu0 %546 }
 0x65e   :  { %v549_v10 = vmul.f32 %v547_v4, %v514_v9  ;;  %v531_v11 = vadd.f32 %v1170_v57, %v530_v0 }
 0x660   :  { %v550_v14 = vadd.f32 %v1083_v1, %v549_v10  ;;  %v535_v15 = vsel %vm534_vm1, %v1170_v57, %v531_v11 }
 0x661   :  { %v540_v17 = vsel %vm537_vm2, %v539_v16, %v535_v15 }
 0x662   :  { %1171 = vtanh.f32 %v550_v14  ;;  %v552_v18 = vsub.f32 1.0, %v540_v17  ;;  %v554_v21 = vmul.f32 %v540_v17, %v1423_v36 }
 0x668   :  { %v1172_v19 = vpop.eup %1171 }
 0x669   :  { %v553_v20 = vmul.f32 %v1172_v19, %v552_v18  ;;  %v35_v19 = vld [vmem:[%s1569_s3 + $0x18] sm:$0xff] }
 0x66a   :  { %741 = vmatpush.msra.mxu0 %v35_v19 }
 0x66b   :  { %v1448_v22 = vadd.f32 %v554_v21, %v553_v20  ;;  %v1093_v20 = vld [vmem:[%s1566_s0 + $0x1e] sm:$0x3] }
 0x66d   :  { %1084 = vmatmul.msk.f32.vlgmr.msrb.gmra.mxu2 %vm41_vm8, %v1448_v22 }
 0x66e   :  { %890 = vmatpush.msrb.mxu2 %v1390_v2 }
 0x670   :  { %891 = vmatpush.msrb.mxu2 %v1395_v3 }
 0x672   :  { %892 = vmatpush.msrb.mxu2 %v1402_v5 }
 0x674   :  { %893 = vmatpush.msrb.mxu2 %v1410_v8 }
 0x675   :  { %1098 = vmatmul.msk.f32.vlgmr.msra.gmra.mxu2 %vm41_vm8, %v1340_v27 }
 0x67d   :  { %1102 = vmatmul.msk.f32.vlgmr.msrb.gmra.mxu2 %vm41_vm8, %v1448_v22 }
 0x6f0   :  { %v576_v23 = vpop.f32.mrf.mxu2 }
 0x6f1   :  { %v629_v24 = vadd.f32 %v576_v23, %v1309_v6  ;;  %604 = vrot.lane.b32.xlu1 %v576_v23, %s1251_s1  ;;  %v581_v26 = vadd.f32 %v1085_v25, %v576_v23  ;;  %v34_v23 = vld [vmem:[%s1569_s3 + $0x10] sm:$0xff] }
 0x6f2   :  { %742 = vmatpush.msra.mxu0 %v34_v23 }
 0x6f3   :  { %631 = vrot.lane.b32.xlu2 %v629_v24, %s1249_s9  ;;  %v1086_v28 = vmul.f32 -1.442695, %v581_v26  ;;  %v978_v24 = vld [vmem:[%s1571_s5 + $0x10] sm:$0xff] }
 0x6f5   :  { %1173 = vpow2.f32 %v1086_v28  ;;  %v33_v28 = vld [vmem:[%s1569_s3 + $0x8] sm:$0xff] }
 0x6f6   :  { %743 = vmatpush.msra.mxu0 %v33_v28 }
 0x6fb   :  { %v1174_v29 = vpop.eup %1173 }
 0x6fc   :  { %v585_v30 = vadd.f32 1.0, %v1174_v29  ;;  %v977_v29 = vld [vmem:[%s1571_s5 + $0x8] sm:$0xff] }
 0x6fe   :  { %1175 = vrcp.f32 %v585_v30  ;;  %v597_v42 = vand.u32 2147483648, %v585_v30  ;;  %vm591_vm4 = vweird.f32 %v585_v30  ;;  %v595_v43 = vand.u32 2147483647, %v585_v30 }
 0x700   :  { %v598_v47 = vor.u32 1.1754944e-38, %v597_v42  ;;  %vm596_vm6 = vcmp.eq.f32.partialorder %v595_v43, 8.507059e+37 }
 0x704   :  { %v1176_v31 = vpop.eup %1175 }
 0x705   :  { %v587_v32 = vmul.f32 %v1176_v31, %v585_v30  ;;  %vm592_vm3 = vweird.f32 %v1176_v31  ;;  %v32_v30 = vld [vmem:[%s1569_s3] sm:$0xff] }
 0x706   :  { %vm593_vm5 = vmor %vm591_vm4, %vm592_vm3  ;;  %744 = vmatpush.msra.mxu0 %v32_v30  ;;  %vm774_vm4 = vcmask 123904  }
 0x707   :  { %v588_v37 = vsub.f32 1.0, %v587_v32  ;;  %v976_v32 = vld [vmem:[%s1571_s5] sm:$0xff] }
 0x708   :  { %840 = vmatpush.msrb.mxu0 %v1390_v2 }
 0x709   :  { %v589_v39 = vmul.f32 %v1176_v31, %v588_v37 }
 0x70a   :  { %841 = vmatpush.msrb.mxu0 %v1395_v3 }
 0x70b   :  { %v590_v40 = vadd.f32 %v1176_v31, %v589_v39 }
 0x70c   :  { %842 = vmatpush.msrb.mxu0 %v1402_v5 }
 0x70d   :  { %v594_v45 = vsel %vm593_vm5, %v1176_v31, %v590_v40  ;;  %vm1032_vm5 = vcmask 33792  }
 0x70e   :  { %v599_v49 = vsel %vm596_vm6, %v598_v47, %v594_v45  ;;  %843 = vmatpush.msrb.mxu0 %v1410_v8 }
 0x74d   :  { %v632_v46 = vpop.permute.xlu2 %631 }
 0x74e   :  { %v634_v50 = vmul.f32 %v632_v46, %v599_v49 }
 0x750   :  { %v635_v55 = vadd.f32 %v1089_v52, %v634_v50 }
 0x763   :  { %v605_v34 = vpop.permute.xlu1 %604 }
 0x764   :  { %v607_v35 = vadd.f32 %v1087_v33, %v605_v34 }
 0x766   :  { %v1088_v38 = vmul.f32 -1.442695, %v607_v35 }
 0x768   :  { %1177 = vpow2.f32 %v1088_v38 }
 0x76e   :  { %v1178_v41 = vpop.eup %1177 }
 0x76f   :  { %v611_v44 = vadd.f32 1.0, %v1178_v41 }
 0x771   :  { %1179 = vrcp.f32 %v611_v44  ;;  %v623_v57 = vand.u32 2147483648, %v611_v44  ;;  %v621_v59 = vand.u32 2147483647, %v611_v44  ;;  %vm617_vm9 = vweird.f32 %v611_v44 }
 0x772   :  { %1181 = vtanh.f32 %v635_v55 }
 0x773   :  { %v624_v61 = vor.u32 1.1754944e-38, %v623_v57  ;;  %vm622_vm11 = vcmp.eq.f32.partialorder %v621_v59, 8.507059e+37 }
 0x777   :  { %v1180_v53 = vpop.eup %1179 }
 0x778   :  { %v613_v54 = vmul.f32 %v1180_v53, %v611_v44  ;;  %vm618_vm7 = vweird.f32 %v1180_v53  ;;  %v1182_v1 = vpop.eup %1181 }
 0x779   :  { %vm619_vm10 = vmor %vm617_vm9, %vm618_vm7 }
 0x77a   :  { %v614_v56 = vsub.f32 1.0, %v613_v54 }
 0x77c   :  { %v615_v58 = vmul.f32 %v1180_v53, %v614_v56 }
 0x77e   :  { %v616_v60 = vadd.f32 %v1180_v53, %v615_v58 }
 0x780   :  { %v620_v62 = vsel %vm619_vm10, %v1180_v53, %v616_v60 }
 0x781   :  { %v625_v63 = vsel %vm622_vm11, %v624_v61, %v620_v62  ;;  %v795_v62 = vpop.f32.mrf.mxu2 }
 0x782   :  { %v637_v0 = vsub.f32 1.0, %v625_v63  ;;  %v639_v9 = vmul.f32 %v625_v63, %v1448_v22  ;;  %v766_v63 = vpop.f32.mrf.mxu1 }
 0x784   :  { %v638_v4 = vmul.f32 %v1182_v1, %v637_v0 }
 0x786   :  { %v1473_v10 = vadd.f32 %v639_v9, %v638_v4 }
 0x788   :  { %1090 = vmatmul.msk.f32.vlgmr.msrb.gmra.mxu3 %vm41_vm8, %v1473_v10 }
 0x789   :  { %915 = vmatpush.msrb.mxu3 %v1390_v2 }
 0x78a   :  { %v870_v23 = vpop.f32.mrf.mxu1 }
 0x78b   :  { %916 = vmatpush.msrb.mxu3 %v1395_v3  ;;  %v1095_v3 = vld [vmem:[%s1566_s0 + $0x2e] sm:$0x3] }
 0x78d   :  { %917 = vmatpush.msrb.mxu3 %v1402_v5 }
 0x78f   :  { %918 = vmatpush.msrb.mxu3 %v1410_v8 }
 0x790   :  { %1099 = vmatmul.msk.f32.vlgmr.msra.gmra.mxu3 %vm41_vm8, %v1357_v7 }
 0x798   :  { %1103 = vmatmul.msk.f32.vlgmr.msrb.gmra.mxu3 %vm41_vm8, %v1473_v10 }
 0x80b   :  { %v661_v11 = vpop.f32.mrf.mxu3 }
 0x80c   :  { %v714_v12 = vadd.f32 %v661_v11, %v1309_v6  ;;  %689 = vrot.lane.b32.xlu0 %v661_v11, %s1251_s1  ;;  %v666_v14 = vadd.f32 %v1091_v13, %v661_v11  ;;  %v979_v6 = vld [vmem:[%s1571_s5 + $0x18] sm:$0xff] }
 0x80d   :  { %1019 = vmatpush.msra.mxu1 %v979_v6 }
 0x80e   :  { %716 = vrot.lane.b32.xlu1 %v714_v12, %s1249_s9  ;;  %v1092_v15 = vmul.f32 -1.442695, %v666_v14  ;;  %v895_v12 = vpop.f32.mrf.mxu2  ;;  %s1039_s9 = sshll.u32 %s1252_s20, 4  ;;  %s1040_s9 = int_to_ptr.vmem [resolvable:$true] %s1039_s9 }
 0x80f   :  { %1020 = vmatpush.msra.mxu1 %v978_v24 }
 0x810   :  { %1183 = vpow2.f32 %v1092_v15  ;;  %v1111_v15 = vld [vmem:[%s1570_s4] ss:$0 sm:$0xff] }
 0x811   :  { %1021 = vmatpush.msra.mxu1 %v977_v29 }
 0x813   :  { %1022 = vmatpush.msra.mxu1 %v976_v32  ;;  %v820_v61 = vpop.f32.mrf.mxu3 }
 0x816   :  { %v1184_v16 = vpop.eup %1183 }
 0x817   :  { %v670_v17 = vadd.f32 1.0, %v1184_v16 }
 0x819   :  { %1185 = vrcp.f32 %v670_v17  ;;  %v682_v38 = vand.u32 2147483648, %v670_v17  ;;  %vm676_vm13 = vweird.f32 %v670_v17  ;;  %v680_v40 = vand.u32 2147483647, %v670_v17 }
 0x81b   :  { %v683_v43 = vor.u32 1.1754944e-38, %v682_v38  ;;  %vm681_vm15 = vcmp.eq.f32.partialorder %v680_v40, 8.507059e+37  ;;  %v920_v11 = vpop.f32.mrf.mxu3 }
 0x81f   :  { %v1186_v18 = vpop.eup %1185 }
 0x820   :  { %v672_v21 = vmul.f32 %v1186_v18, %v670_v17  ;;  %vm677_vm12 = vweird.f32 %v1186_v18 }
 0x821   :  { %vm678_vm14 = vmor %vm676_vm13, %vm677_vm12 }
 0x822   :  { %v673_v31 = vsub.f32 1.0, %v672_v21 }
 0x824   :  { %v674_v34 = vmul.f32 %v1186_v18, %v673_v31 }
 0x826   :  { %v675_v35 = vadd.f32 %v1186_v18, %v674_v34 }
 0x828   :  { %v679_v41 = vsel %vm678_vm14, %v1186_v18, %v675_v35 }
 0x829   :  { %v684_v2 = vsel %vm681_vm15, %v683_v43, %v679_v41 }
 0x87e   :  { %v690_v25 = vpop.permute.xlu0 %689 }
 0x87f   :  { %v692_v26 = vadd.f32 %v1093_v20, %v690_v25 }
 0x880   :  { %v717_v42 = vpop.permute.xlu1 %716 }
 0x881   :  { %v1094_v33 = vmul.f32 -1.442695, %v692_v26  ;;  %v719_v44 = vmul.f32 %v717_v42, %v684_v2 }
 0x883   :  { %1187 = vpow2.f32 %v1094_v33  ;;  %v720_v46 = vadd.f32 %v1095_v3, %v719_v44 }
 0x889   :  { %v1188_v37 = vpop.eup %1187 }
 0x88a   :  { %v696_v39 = vadd.f32 1.0, %v1188_v37 }
 0x88c   :  { %1189 = vrcp.f32 %v696_v39  ;;  %v708_v8 = vand.u32 2147483648, %v696_v39  ;;  %v706_v50 = vand.u32 2147483647, %v696_v39  ;;  %vm702_vm1 = vweird.f32 %v696_v39 }
 0x88d   :  { %1191 = vtanh.f32 %v720_v46 }
 0x88e   :  { %v709_v53 = vor.u32 1.1754944e-38, %v708_v8  ;;  %vm707_vm3 = vcmp.eq.f32.partialorder %v706_v50, 8.507059e+37  ;;  %v982_v8 = vld [vmem:[%s1571_s5 + $0x30] sm:$0xff] }
 0x892   :  { %v1190_v5 = vpop.eup %1189 }
 0x893   :  { %v698_v45 = vmul.f32 %v1190_v5, %v696_v39  ;;  %vm703_vm0 = vweird.f32 %v1190_v5  ;;  %v1192_v57 = vpop.eup %1191 }
 0x894   :  { %vm704_vm2 = vmor %vm702_vm1, %vm703_vm0 }
 0x895   :  { %v699_v47 = vsub.f32 1.0, %v698_v45 }
 0x897   :  { %v700_v49 = vmul.f32 %v1190_v5, %v699_v47  ;;  %v983_v47 = vld [vmem:[%s1571_s5 + $0x38] sm:$0xff] }
 0x899   :  { %v701_v52 = vadd.f32 %v1190_v5, %v700_v49 }
 0x89b   :  { %v705_v54 = vsel %vm704_vm2, %v1190_v5, %v701_v52  ;;  %v981_v52 = vld [vmem:[%s1571_s5 + $0x28] sm:$0xff] }
 0x89c   :  { %v710_v55 = vsel %vm707_vm3, %v709_v53, %v705_v54 }
 0x89d   :  { %v722_v56 = vsub.f32 1.0, %v710_v55  ;;  %v724_v59 = vmul.f32 %v710_v55, %v1473_v10  ;;  %v980_v55 = vld [vmem:[%s1571_s5 + $0x20] sm:$0xff] }
 0x89f   :  { %v723_v58 = vmul.f32 %v1192_v57, %v722_v56 }
 0x8a1   :  { %v725_v60 = vadd.f32 %v724_v59, %v723_v58 }
 0x8a3   :  { %1096 = vmatmul.msk.f32.vlgmr.msra.gmra.mxu0 %vm41_vm8, %v725_v60  ;;  %1105 = vmatmul.msk.f32.vlgmr.msra.gmra.mxu1 %vm41_vm8, %v725_v60 }
 0x8a4   :  { %999 = vmatpush.msra.mxu0 %v983_v47 }
 0x8a6   :  { %1000 = vmatpush.msra.mxu0 %v982_v8 }
 0x8a8   :  { %1001 = vmatpush.msra.mxu0 %v981_v52 }
 0x8aa   :  { %1002 = vmatpush.msra.mxu0 %v980_v55 }
 0x8ab   :  { %1100 = vmatmul.msk.f32.vlgmr.msrb.gmra.mxu0 %vm41_vm8, %v1374_v51 }
 0x920   :  { %v746_v0 = vpop.f32.mrf.mxu0 }
 0x921   :  { %v821_v1 = vadd.f32 %v820_v61, %v746_v0  ;;  %v796_v4 = vadd.f32 %v795_v62, %v746_v0  ;;  %v767_v9 = vadd.f32 %v766_v63, %v746_v0  ;;  %v921_v13 = vadd.f32 %v920_v11, %v746_v0 }
 0x922   :  { %v896_v14 = vadd.f32 %v895_v12, %v746_v0  ;;  %v871_v29 = vadd.f32 %v870_v23, %v746_v0 }
 0x923   :  { %1193 = vtanh.f32 %v821_v1 }
 0x924   :  { %1195 = vtanh.f32 %v796_v4 }
 0x925   :  { %1197 = vtanh.f32 %v767_v9 }
 0x926   :  { %1199 = vtanh.f32 %v921_v13 }
 0x927   :  { %1201 = vtanh.f32 %v896_v14 }
 0x928   :  { %v845_v16 = vpop.f32.mrf.mxu0 }
 0x929   :  { %v1194_v17 = vpop.eup %1193  ;;  %v846_v18 = vadd.f32 %v845_v16, %v746_v0 }
 0x92a   :  { %v1196_v19 = vpop.eup %1195  ;;  %v824_v6 = vmul.f32 %v1194_v17, %v1111_v15 }
 0x92b   :  { %v1198_v20 = vpop.eup %1197  ;;  %1203 = vtanh.f32 %v846_v18  ;;  %v799_v21 = vmul.f32 %v1196_v19, %v1111_v15 }
 0x92c   :  { %v825_v24 = vsel %vm774_vm4, %v824_v6, 0.0  ;;  %v773_v25 = vmul.f32 %v1198_v20, %v1111_v15  ;;  %v1200_v26 = vpop.eup %1199  ;;  %1205 = vtanh.f32 %v871_v29 }
 0x92d   :  { %826 = vadd.xlane.f32.xlu1 %v825_v24  ;;  %v800_v28 = vsel %vm774_vm4, %v799_v21, 0.0  ;;  %v1202_v30 = vpop.eup %1201  ;;  %v924_v32 = vmul.f32 %v1200_v26, %v1111_v15 }
 0x92e   :  { %801 = vadd.xlane.f32.xlu0 %v800_v28  ;;  %v775_v31 = vsel %vm774_vm4, %v773_v25, 0.0  ;;  %v899_v34 = vmul.f32 %v1202_v30, %v1111_v15 }
 0x92f   :  { %776 = vadd.xlane.f32.xlu2 %v775_v31  ;;  %v925_v37 = vsel %vm774_vm4, %v924_v32, 0.0 }
 0x930   :  { %v900_v39 = vsel %vm774_vm4, %v899_v34, 0.0 }
 0x931   :  { %v1204_v33 = vpop.eup %1203 }
 0x932   :  { %v849_v35 = vmul.f32 %v1204_v33, %v1111_v15  ;;  %v1206_v40 = vpop.eup %1205 }
 0x933   :  { %v874_v41 = vmul.f32 %v1206_v40, %v1111_v15 }
 0x934   :  { %v850_v38 = vsel %vm774_vm4, %v849_v35, 0.0 }
 0x935   :  { %926 = vadd.xlane.f32.xlu1 %v925_v37  ;;  %v875_v42 = vsel %vm774_vm4, %v874_v41, 0.0 }
 0x936   :  { %901 = vadd.xlane.f32.xlu0 %v900_v39 }
 0x937   :  { %851 = vadd.xlane.f32.xlu2 %v850_v38 }
 0x93f   :  { %876 = vadd.xlane.f32.xlu2 %v875_v42 }
 0x9a0   :  { %v827_v5 = vpop.xlane.xlu1 %826 }
 0x9a1   :  { %v802_v2 = vpop.xlane.xlu0 %801 }
 0x9a2   :  { %v777_v43 = vpop.xlane.xlu2 %776 }
 0x9a3   :  { %v928_v3 = vmax.f32 %v777_v43, %v802_v2 }
 0x9a5   :  { %v929_v45 = vmax.f32 %v928_v3, %v827_v5 }
 0x9a8   :  { %v927_v56 = vpop.xlane.xlu1 %926 }
 0x9a9   :  { %v902_v53 = vpop.xlane.xlu0 %901 }
 0x9aa   :  { %v852_v44 = vpop.xlane.xlu2 %851 }
 0x9ab   :  { %v930_v46 = vmax.f32 %v929_v45, %v852_v44 }
 0x9b2   :  { %v877_v49 = vpop.xlane.xlu2 %876 }
 0x9b3   :  { %v931_v50 = vmax.f32 %v930_v46, %v877_v49 }
 0x9b5   :  { %v932_v54 = vmax.f32 %v931_v50, %v902_v53 }
 0x9b7   :  { %v933_v57 = vmax.f32 %v932_v54, %v927_v56 }
 0x9b9   :  { %v934_v58 = vsub.f32 %v777_v43, %v933_v57  ;;  %v937_v59 = vsub.f32 %v802_v2, %v933_v57  ;;  %v940_v60 = vsub.f32 %v827_v5, %v933_v57  ;;  %v943_v61 = vsub.f32 %v852_v44, %v933_v57 }
 0x9ba   :  { %v946_v1 = vsub.f32 %v877_v49, %v933_v57  ;;  %v949_v9 = vsub.f32 %v902_v53, %v933_v57  ;;  %v952_v12 = vsub.f32 %v927_v56, %v933_v57 }
 0x9bb   :  { %v935_v62 = vmul.f32 1.442695, %v934_v58  ;;  %v938_v63 = vmul.f32 1.442695, %v937_v59  ;;  %v941_v0 = vmul.f32 1.442695, %v940_v60 }
 0x9bc   :  { %v944_v4 = vmul.f32 1.442695, %v943_v61  ;;  %v947_v11 = vmul.f32 1.442695, %v946_v1  ;;  %v950_v13 = vmul.f32 1.442695, %v949_v9 }
 0x9bd   :  { %1207 = vpow2.f32 %v935_v62  ;;  %v953_v16 = vmul.f32 1.442695, %v952_v12 }
 0x9be   :  { %1209 = vpow2.f32 %v938_v63 }
 0x9bf   :  { %1211 = vpow2.f32 %v941_v0 }
 0x9c0   :  { %1213 = vpow2.f32 %v944_v4 }
 0x9c1   :  { %1215 = vpow2.f32 %v947_v11 }
 0x9c2   :  { %1217 = vpow2.f32 %v950_v13 }
 0x9c3   :  { %v1208_v14 = vpop.eup %1207  ;;  %1219 = vpow2.f32 %v953_v16 }
 0x9c4   :  { %v1210_v15 = vpop.eup %1209  ;;  %v962_v17 = vmul.f32 %v1208_v14, %v1323_v48 }
 0x9c5   :  { %v1212_v18 = vpop.eup %1211  ;;  %v955_v19 = vadd.f32 %v1210_v15, %v1208_v14  ;;  %v963_v6 = vmul.f32 %v1210_v15, %v1340_v27 }
 0x9c6   :  { %v1214_v20 = vpop.eup %1213  ;;  %v965_v24 = vmul.f32 %v1212_v18, %v1357_v7 }
 0x9c7   :  { %v956_v21 = vadd.f32 %v1212_v18, %v955_v19  ;;  %v964_v23 = vadd.f32 %v963_v6, %v962_v17  ;;  %v1216_v25 = vpop.eup %1215  ;;  %v967_v29 = vmul.f32 %v1214_v20, %v1374_v51  ;;  %v1112_v51 = vld [vmem:[%s1572_s6] ss:$0 sm:$0xff] }
 0x9c8   :  { %v1218_v32 = vpop.eup %1217  ;;  %v969_v48 = vmul.f32 %v1216_v25, %v1423_v36  ;;  %v1024_v36 = vpop.f32.mrf.mxu1 }
 0x9c9   :  { %v957_v26 = vadd.f32 %v1214_v20, %v956_v21  ;;  %v966_v28 = vadd.f32 %v965_v24, %v964_v23  ;;  %v1220_v34 = vpop.eup %1219  ;;  %v971_v37 = vmul.f32 %v1218_v32, %v1448_v22 }
 0x9ca   :  { %v973_v7 = vmul.f32 %v1220_v34, %v1473_v10 }
 0x9cb   :  { %v958_v30 = vadd.f32 %v1216_v25, %v957_v26  ;;  %v968_v31 = vadd.f32 %v967_v29, %v966_v28 }
 0x9cd   :  { %v959_v33 = vadd.f32 %v1218_v32, %v958_v30  ;;  %v970_v27 = vadd.f32 %v969_v48, %v968_v31 }
 0x9cf   :  { %v960_v35 = vadd.f32 %v1220_v34, %v959_v33  ;;  %v972_v38 = vadd.f32 %v971_v37, %v970_v27 }
 0x9d1   :  { %1221 = vrcp.f32 %v960_v35  ;;  %v974_v39 = vadd.f32 %v973_v7, %v972_v38 }
 0x9d7   :  { %v1222_v40 = vpop.eup %1221 }
 0x9d8   :  { %v975_v41 = vmul.f32 %v1222_v40, %v974_v39 }
 0x9da   :  { %1104 = vmatmul.msk.f32.vlgmr.msra.gmra.mxu0 %vm41_vm8, %v975_v41 }
 0xa57   :  { %v1004_v42 = vpop.f32.mrf.mxu0 }
 0xa58   :  { %v1025_v22 = vadd.f32 %v1024_v36, %v1004_v42 }
 0xa5a   :  { %v1031_v10 = vadd.f32 %v1112_v51, %v1025_v22 }
 0xa5c   :  { %1033 = vst.msk [vmem:[#allocation2] sm:$0x3] %vm1032_vm5, %v1031_v10 }
 0xa5d   :  { %1044 = dma.vmem_to_hbm [thread:$0]  %s1040_s9, 32, %s1042_s22, [#allocation3]  }
 0xa5e   :  { %1247 = dma.done.wait [#allocation3], 32  }
 0xa5f   :  { %1248 = vsyncadd [#allocation3], 4294967264 }
 0xa60   :  { %1049 = vsyncpa [#allocation3], 1 }

</bundles_post_ra>
